<compile_context>
chip_gen: v7x
topology: tpu7x:2x2x1
jax: 0.10.0
libtpu: 0.0.40
codegen_flags: <defaults>
</compile_context>

<pallas_src>
import jax
import jax.numpy as jnp
import numpy as np
from jax.experimental import pallas as pl
from jax.experimental.pallas import tpu as pltpu

CLASS_SIZE = 10
IMG_DIM = 28 * 28              # 784
IN_DIM = IMG_DIM + CLASS_SIZE  # 794
Z_DIM = 32
LANE = 128


def _round_up(n, m):
    return (n + m - 1) // m * m


# Lane-padded dims
IN_PAD = _round_up(IN_DIM, LANE)    # 896
H1_PAD = _round_up(200, LANE)       # 256
H2_PAD = _round_up(100, LANE)       # 128
Z_PAD = _round_up(Z_DIM, LANE)      # 128
IMG_PAD = _round_up(IMG_DIM, LANE)  # 896


def _cvae_kernel(x_ref, eps_ref,
                 w1, b1, w2, b2, wm, bm, wv, bv,
                 wd1, bd1, wd2, bd2, wd3, bd3,
                 xrec_ref, mean_ref, var_ref, z_ref):
    bf16 = jnp.bfloat16
    x = x_ref[...]                          # (TILE_B, IN_PAD) bf16

    # ---- encoder (bf16 MXU, f32 accumulate, f32 elementwise) ----
    h = jnp.dot(x, w1[...], preferred_element_type=jnp.float32) + b1[...]
    h = jnp.maximum(h, 0.0)
    h = jnp.dot(h.astype(bf16), w2[...], preferred_element_type=jnp.float32) + b2[...]
    h = jnp.maximum(h, 0.0)
    hb = h.astype(bf16)
    mean = jnp.dot(hb, wm[...], preferred_element_type=jnp.float32) + bm[...]
    var = jnp.dot(hb, wv[...], preferred_element_type=jnp.float32) + bv[...]

    # ---- reparameterization: z = mean + eps * exp(0.5 * var) ----
    z = mean + eps_ref[...] * jnp.exp(0.5 * var)

    # ---- decoder ----
    d = jnp.dot(z.astype(bf16), wd1[...], preferred_element_type=jnp.float32) + bd1[...]
    d = jnp.maximum(d, 0.0)
    d = jnp.dot(d.astype(bf16), wd2[...], preferred_element_type=jnp.float32) + bd2[...]
    d = jnp.maximum(d, 0.0)
    logits = jnp.dot(d.astype(bf16), wd3[...], preferred_element_type=jnp.float32) + bd3[...]

    xrec_ref[...] = jax.nn.sigmoid(logits)
    mean_ref[...] = mean
    var_ref[...] = var
    z_ref[...] = z


def init_params(key, z_dim=Z_DIM):
    """PyTorch-style uniform(-1/sqrt(fan_in), 1/sqrt(fan_in)) init.
    Weights are [in, out]; biases are [1, out]. Returned in f32 at logical shapes."""
    dims = [
        ("enc1", IN_DIM, 200),
        ("enc2", 200, 100),
        ("encmean", 100, z_dim),
        ("encvar", 100, z_dim),
        ("dec1", z_dim, 100),
        ("dec2", 100, 200),
        ("dec3", 200, IMG_DIM),
    ]
    params = []
    for _, fin, fout in dims:
        key, kw, kb = jax.random.split(key, 3)
        bound = 1.0 / np.sqrt(fin)
        w = jax.random.uniform(kw, (fin, fout), jnp.float32, -bound, bound)
        b = jax.random.uniform(kb, (1, fout), jnp.float32, -bound, bound)
        params.append(w)
        params.append(b)
    return params


def _pad2(a, rows, cols, dtype):
    out = jnp.zeros((rows, cols), dtype)
    return out.at[: a.shape[0], : a.shape[1]].set(a.astype(dtype))


def pack_params(params):
    """Zero-pad to lane-multiple shapes; weights -> bf16, biases -> f32."""
    (w1, b1, w2, b2, wm, bm, wv, bv, wd1, bd1, wd2, bd2, wd3, bd3) = params
    bf16, f32 = jnp.bfloat16, jnp.float32
    return [
        _pad2(w1, IN_PAD, H1_PAD, bf16),  _pad2(b1, 1, H1_PAD, f32),
        _pad2(w2, H1_PAD, H2_PAD, bf16),  _pad2(b2, 1, H2_PAD, f32),
        _pad2(wm, H2_PAD, Z_PAD, bf16),   _pad2(bm, 1, Z_PAD, f32),
        _pad2(wv, H2_PAD, Z_PAD, bf16),   _pad2(bv, 1, Z_PAD, f32),
        _pad2(wd1, Z_PAD, H2_PAD, bf16),  _pad2(bd1, 1, H2_PAD, f32),
        _pad2(wd2, H2_PAD, H1_PAD, bf16), _pad2(bd2, 1, H1_PAD, f32),
        _pad2(wd3, H1_PAD, IMG_PAD, bf16), _pad2(bd3, 1, IMG_PAD, f32),
    ]


def cvae_forward(x, eps, packed_params, *, max_tile_b=256):
    """x: (B, 794) f32, eps: (B, Z_DIM) f32, packed_params from pack_params()."""
    B = x.shape[0]
    tile_b = min(max_tile_b, _round_up(B, 8))
    b_pad = _round_up(B, tile_b)
    grid = (b_pad // tile_b,)

    # Lane/batch-pad inputs (zeros keep the padded math exact; padded batch
    # rows are sliced off at the end).
    x_pad = jnp.zeros((b_pad, IN_PAD), jnp.bfloat16).at[:B, :IN_DIM].set(
        x.astype(jnp.bfloat16))
    eps_pad = jnp.zeros((b_pad, Z_PAD), jnp.float32).at[:B, :Z_DIM].set(eps)

    def batched(cols):
        return pl.BlockSpec((tile_b, cols), lambda i: (i, 0))

    def resident(shape):
        # Constant block index -> stays VMEM-resident across grid steps.
        return pl.BlockSpec(shape, lambda i: (0, 0))

    in_specs = [batched(IN_PAD), batched(Z_PAD)]
    in_specs += [resident(p.shape) for p in packed_params]

    out_shape = (
        jax.ShapeDtypeStruct((b_pad, IMG_PAD), jnp.float32),  # reconstruction (padded)
        jax.ShapeDtypeStruct((b_pad, Z_PAD), jnp.float32),    # mean (padded)
        jax.ShapeDtypeStruct((b_pad, Z_PAD), jnp.float32),    # log-variance (padded)
        jax.ShapeDtypeStruct((b_pad, Z_PAD), jnp.float32),    # z sample (padded)
    )
    out_specs = (batched(IMG_PAD), batched(Z_PAD), batched(Z_PAD), batched(Z_PAD))

    xrec_p, mean_p, var_p, z_p = pl.pallas_call(
        _cvae_kernel,
        out_shape=out_shape,
        grid=grid,
        in_specs=in_specs,
        out_specs=out_specs,
        compiler_params=pltpu.CompilerParams(
            dimension_semantics=("parallel",)),   # shard batch over TCs on v7x
    )(x_pad, eps_pad, *packed_params)

    return (xrec_p[:B, :IMG_DIM], mean_p[:B, :Z_DIM],
            var_p[:B, :Z_DIM], z_p[:B, :Z_DIM])


def _reference_forward(x, eps, params):
    """Pure-JAX reference using the same bf16-at-dot / f32-elementwise recipe."""
    (w1, b1, w2, b2, wm, bm, wv, bv, wd1, bd1, wd2, bd2, wd3, bd3) = params
    bf16 = jnp.bfloat16

    def lin(a, w, b):
        return jnp.dot(a.astype(bf16), w.astype(bf16),
                       preferred_element_type=jnp.float32) + b

    h = jnp.maximum(lin(x, w1, b1), 0.0)
    h = jnp.maximum(lin(h, w2, b2), 0.0)
    mean = lin(h, wm, bm)
    var = lin(h, wv, bv)
    z = mean + eps * jnp.exp(0.5 * var)
    d = jnp.maximum(lin(z, wd1, bd1), 0.0)
    d = jnp.maximum(lin(d, wd2, bd2), 0.0)
    xr = jax.nn.sigmoid(lin(d, wd3, bd3))
    return xr, mean, var, z


if __name__ == "__main__":
    key = jax.random.PRNGKey(0)
    k_param, k_img, k_label, k_eps = jax.random.split(key, 4)

    B = 8
    raw_params = init_params(k_param, Z_DIM)
    packed = pack_params(raw_params)

    # Inputs mirroring the PyTorch usage: flattened image + one-hot label.
    img = jax.random.uniform(k_img, (B, IMG_DIM), jnp.float32)
    labels = jax.random.randint(k_label, (B,), 0, CLASS_SIZE)
    onehot = jnp.eye(CLASS_SIZE, dtype=jnp.float32)[labels]
    x = jnp.concatenate([img, onehot], axis=1)                  # (B, 794)

    # epsilon ~ N(0,1) (torch.randn in _sample_z) generated outside the kernel.
    eps = jax.random.normal(k_eps, (B, Z_DIM), jnp.float32)

    xrec, mean, var, z = cvae_forward(x, eps, packed)
    jax.block_until_ready(xrec)

    xr_r, m_r, v_r, z_r = _reference_forward(x, eps, raw_params)
    assert xrec.shape == (B, IMG_DIM) and mean.shape == (B, Z_DIM)
    assert var.shape == (B, Z_DIM) and z.shape == (B, Z_DIM)
    np.testing.assert_allclose(np.asarray(xrec), np.asarray(xr_r), rtol=2e-3, atol=2e-3)
    np.testing.assert_allclose(np.asarray(mean), np.asarray(m_r), rtol=2e-3, atol=2e-3)
    np.testing.assert_allclose(np.asarray(var), np.asarray(v_r), rtol=2e-3, atol=2e-3)
    np.testing.assert_allclose(np.asarray(z), np.asarray(z_r), rtol=2e-3, atol=2e-3)

    print("KERNEL_OK")
</pallas_src>

<mosaic_0001>
module attributes {stable_mosaic.version = 11 : i64} {
  func.func @_cvae_kernel(%arg0: i32, %arg1: memref<8x896xbf16, #tpu.memory_space<vmem>>, %arg2: memref<8x128xf32, #tpu.memory_space<vmem>>, %arg3: memref<896x256xbf16, #tpu.memory_space<vmem>>, %arg4: memref<1x256xf32, #tpu.memory_space<vmem>>, %arg5: memref<256x128xbf16, #tpu.memory_space<vmem>>, %arg6: memref<1x128xf32, #tpu.memory_space<vmem>>, %arg7: memref<128x128xbf16, #tpu.memory_space<vmem>>, %arg8: memref<1x128xf32, #tpu.memory_space<vmem>>, %arg9: memref<128x128xbf16, #tpu.memory_space<vmem>>, %arg10: memref<1x128xf32, #tpu.memory_space<vmem>>, %arg11: memref<128x128xbf16, #tpu.memory_space<vmem>>, %arg12: memref<1x128xf32, #tpu.memory_space<vmem>>, %arg13: memref<128x256xbf16, #tpu.memory_space<vmem>>, %arg14: memref<1x256xf32, #tpu.memory_space<vmem>>, %arg15: memref<256x896xbf16, #tpu.memory_space<vmem>>, %arg16: memref<1x896xf32, #tpu.memory_space<vmem>>, %arg17: memref<8x896xf32, #tpu.memory_space<vmem>>, %arg18: memref<8x128xf32, #tpu.memory_space<vmem>>, %arg19: memref<8x128xf32, #tpu.memory_space<vmem>>, %arg20: memref<8x128xf32, #tpu.memory_space<vmem>>) attributes {dimension_semantics = [#tpu.dimension_semantics<parallel>], iteration_bounds = array<i64: 1>, scalar_prefetch = 0 : i64, scratch_operands = 0 : i64, tpu.core_type = #tpu.core_type<tc>, window_params = [{transform_indices = @transform_0, window_bounds = array<i64: 8, 896>}, {transform_indices = @transform_1, window_bounds = array<i64: 8, 128>}, {pipeline_mode = #tpu.pipeline_mode<synchronous>, transform_indices = @transform_2, window_bounds = array<i64: 896, 256>}, {pipeline_mode = #tpu.pipeline_mode<synchronous>, transform_indices = @transform_3, window_bounds = array<i64: 1, 256>}, {pipeline_mode = #tpu.pipeline_mode<synchronous>, transform_indices = @transform_4, window_bounds = array<i64: 256, 128>}, {pipeline_mode = #tpu.pipeline_mode<synchronous>, transform_indices = @transform_5, window_bounds = array<i64: 1, 128>}, {pipeline_mode = #tpu.pipeline_mode<synchronous>, transform_indices = @transform_6, window_bounds = array<i64: 128, 128>}, {pipeline_mode = #tpu.pipeline_mode<synchronous>, transform_indices = @transform_7, window_bounds = array<i64: 1, 128>}, {pipeline_mode = #tpu.pipeline_mode<synchronous>, transform_indices = @transform_8, window_bounds = array<i64: 128, 128>}, {pipeline_mode = #tpu.pipeline_mode<synchronous>, transform_indices = @transform_9, window_bounds = array<i64: 1, 128>}, {pipeline_mode = #tpu.pipeline_mode<synchronous>, transform_indices = @transform_10, window_bounds = array<i64: 128, 128>}, {pipeline_mode = #tpu.pipeline_mode<synchronous>, transform_indices = @transform_11, window_bounds = array<i64: 1, 128>}, {pipeline_mode = #tpu.pipeline_mode<synchronous>, transform_indices = @transform_12, window_bounds = array<i64: 128, 256>}, {pipeline_mode = #tpu.pipeline_mode<synchronous>, transform_indices = @transform_13, window_bounds = array<i64: 1, 256>}, {pipeline_mode = #tpu.pipeline_mode<synchronous>, transform_indices = @transform_14, window_bounds = array<i64: 256, 896>}, {pipeline_mode = #tpu.pipeline_mode<synchronous>, transform_indices = @transform_15, window_bounds = array<i64: 1, 896>}, {transform_indices = @transform_16, window_bounds = array<i64: 8, 896>}, {transform_indices = @transform_17, window_bounds = array<i64: 8, 128>}, {transform_indices = @transform_18, window_bounds = array<i64: 8, 128>}, {transform_indices = @transform_19, window_bounds = array<i64: 8, 128>}]} {
    %c0 = arith.constant 0 : index
    %c0_0 = arith.constant 0 : index
    %0 = vector.load %arg1[%c0, %c0_0] : memref<8x896xbf16, #tpu.memory_space<vmem>>, vector<8x896xbf16>
    %c0_1 = arith.constant 0 : index
    %c0_2 = arith.constant 0 : index
    %1 = vector.load %arg3[%c0_1, %c0_2] : memref<896x256xbf16, #tpu.memory_space<vmem>>, vector<896x256xbf16>
    %cst = arith.constant dense<0.000000e+00> : vector<8x256xf32>
    %2 = tpu.matmul %0, %1, %cst {dimension_numbers = #tpu.dot_dimension_numbers<[1], [0], [0], [1], [0, 0, 1, 1], [], []>} : vector<8x896xbf16>, vector<896x256xbf16>, vector<8x256xf32> -> vector<8x256xf32>
    %c0_3 = arith.constant 0 : index
    %c0_4 = arith.constant 0 : index
    %3 = vector.load %arg4[%c0_3, %c0_4] : memref<1x256xf32, #tpu.memory_space<vmem>>, vector<1x256xf32>
    %4 = vector.broadcast %3 : vector<1x256xf32> to vector<8x256xf32>
    %5 = arith.addf %2, %4 : vector<8x256xf32>
    %cst_5 = arith.constant 0.000000e+00 : f32
    %6 = vector.broadcast %cst_5 : f32 to vector<8x256xf32>
    %7 = arith.maximumf %5, %6 : vector<8x256xf32>
    %8 = arith.truncf %7 : vector<8x256xf32> to vector<8x256xbf16>
    %c0_6 = arith.constant 0 : index
    %c0_7 = arith.constant 0 : index
    %9 = vector.load %arg5[%c0_6, %c0_7] : memref<256x128xbf16, #tpu.memory_space<vmem>>, vector<256x128xbf16>
    %cst_8 = arith.constant dense<0.000000e+00> : vector<8x128xf32>
    %10 = tpu.matmul %8, %9, %cst_8 {dimension_numbers = #tpu.dot_dimension_numbers<[1], [0], [0], [1], [0, 0, 1, 1], [], []>} : vector<8x256xbf16>, vector<256x128xbf16>, vector<8x128xf32> -> vector<8x128xf32>
    %c0_9 = arith.constant 0 : index
    %c0_10 = arith.constant 0 : index
    %11 = vector.load %arg6[%c0_9, %c0_10] : memref<1x128xf32, #tpu.memory_space<vmem>>, vector<1x128xf32>
    %12 = vector.broadcast %11 : vector<1x128xf32> to vector<8x128xf32>
    %13 = arith.addf %10, %12 : vector<8x128xf32>
    %cst_11 = arith.constant 0.000000e+00 : f32
    %14 = vector.broadcast %cst_11 : f32 to vector<8x128xf32>
    %15 = arith.maximumf %13, %14 : vector<8x128xf32>
    %16 = arith.truncf %15 : vector<8x128xf32> to vector<8x128xbf16>
    %c0_12 = arith.constant 0 : index
    %c0_13 = arith.constant 0 : index
    %17 = vector.load %arg7[%c0_12, %c0_13] : memref<128x128xbf16, #tpu.memory_space<vmem>>, vector<128x128xbf16>
    %cst_14 = arith.constant dense<0.000000e+00> : vector<8x128xf32>
    %18 = tpu.matmul %16, %17, %cst_14 {dimension_numbers = #tpu.dot_dimension_numbers<[1], [0], [0], [1], [0, 0, 1, 1], [], []>} : vector<8x128xbf16>, vector<128x128xbf16>, vector<8x128xf32> -> vector<8x128xf32>
    %c0_15 = arith.constant 0 : index
    %c0_16 = arith.constant 0 : index
    %19 = vector.load %arg8[%c0_15, %c0_16] : memref<1x128xf32, #tpu.memory_space<vmem>>, vector<1x128xf32>
    %20 = vector.broadcast %19 : vector<1x128xf32> to vector<8x128xf32>
    %21 = arith.addf %18, %20 : vector<8x128xf32>
    %c0_17 = arith.constant 0 : index
    %c0_18 = arith.constant 0 : index
    %22 = vector.load %arg9[%c0_17, %c0_18] : memref<128x128xbf16, #tpu.memory_space<vmem>>, vector<128x128xbf16>
    %cst_19 = arith.constant dense<0.000000e+00> : vector<8x128xf32>
    %23 = tpu.matmul %16, %22, %cst_19 {dimension_numbers = #tpu.dot_dimension_numbers<[1], [0], [0], [1], [0, 0, 1, 1], [], []>} : vector<8x128xbf16>, vector<128x128xbf16>, vector<8x128xf32> -> vector<8x128xf32>
    %c0_20 = arith.constant 0 : index
    %c0_21 = arith.constant 0 : index
    %24 = vector.load %arg10[%c0_20, %c0_21] : memref<1x128xf32, #tpu.memory_space<vmem>>, vector<1x128xf32>
    %25 = vector.broadcast %24 : vector<1x128xf32> to vector<8x128xf32>
    %26 = arith.addf %23, %25 : vector<8x128xf32>
    %c0_22 = arith.constant 0 : index
    %c0_23 = arith.constant 0 : index
    %27 = vector.load %arg2[%c0_22, %c0_23] : memref<8x128xf32, #tpu.memory_space<vmem>>, vector<8x128xf32>
    %cst_24 = arith.constant 5.000000e-01 : f32
    %28 = vector.broadcast %cst_24 : f32 to vector<8x128xf32>
    %29 = arith.mulf %28, %26 : vector<8x128xf32>
    %30 = math.exp %29 : vector<8x128xf32>
    %31 = arith.mulf %27, %30 : vector<8x128xf32>
    %32 = arith.addf %21, %31 : vector<8x128xf32>
    %33 = arith.truncf %32 : vector<8x128xf32> to vector<8x128xbf16>
    %c0_25 = arith.constant 0 : index
    %c0_26 = arith.constant 0 : index
    %34 = vector.load %arg11[%c0_25, %c0_26] : memref<128x128xbf16, #tpu.memory_space<vmem>>, vector<128x128xbf16>
    %cst_27 = arith.constant dense<0.000000e+00> : vector<8x128xf32>
    %35 = tpu.matmul %33, %34, %cst_27 {dimension_numbers = #tpu.dot_dimension_numbers<[1], [0], [0], [1], [0, 0, 1, 1], [], []>} : vector<8x128xbf16>, vector<128x128xbf16>, vector<8x128xf32> -> vector<8x128xf32>
    %c0_28 = arith.constant 0 : index
    %c0_29 = arith.constant 0 : index
    %36 = vector.load %arg12[%c0_28, %c0_29] : memref<1x128xf32, #tpu.memory_space<vmem>>, vector<1x128xf32>
    %37 = vector.broadcast %36 : vector<1x128xf32> to vector<8x128xf32>
    %38 = arith.addf %35, %37 : vector<8x128xf32>
    %cst_30 = arith.constant 0.000000e+00 : f32
    %39 = vector.broadcast %cst_30 : f32 to vector<8x128xf32>
    %40 = arith.maximumf %38, %39 : vector<8x128xf32>
    %41 = arith.truncf %40 : vector<8x128xf32> to vector<8x128xbf16>
    %c0_31 = arith.constant 0 : index
    %c0_32 = arith.constant 0 : index
    %42 = vector.load %arg13[%c0_31, %c0_32] : memref<128x256xbf16, #tpu.memory_space<vmem>>, vector<128x256xbf16>
    %cst_33 = arith.constant dense<0.000000e+00> : vector<8x256xf32>
    %43 = tpu.matmul %41, %42, %cst_33 {dimension_numbers = #tpu.dot_dimension_numbers<[1], [0], [0], [1], [0, 0, 1, 1], [], []>} : vector<8x128xbf16>, vector<128x256xbf16>, vector<8x256xf32> -> vector<8x256xf32>
    %c0_34 = arith.constant 0 : index
    %c0_35 = arith.constant 0 : index
    %44 = vector.load %arg14[%c0_34, %c0_35] : memref<1x256xf32, #tpu.memory_space<vmem>>, vector<1x256xf32>
    %45 = vector.broadcast %44 : vector<1x256xf32> to vector<8x256xf32>
    %46 = arith.addf %43, %45 : vector<8x256xf32>
    %cst_36 = arith.constant 0.000000e+00 : f32
    %47 = vector.broadcast %cst_36 : f32 to vector<8x256xf32>
    %48 = arith.maximumf %46, %47 : vector<8x256xf32>
    %49 = arith.truncf %48 : vector<8x256xf32> to vector<8x256xbf16>
    %c0_37 = arith.constant 0 : index
    %c0_38 = arith.constant 0 : index
    %50 = vector.load %arg15[%c0_37, %c0_38] : memref<256x896xbf16, #tpu.memory_space<vmem>>, vector<256x896xbf16>
    %cst_39 = arith.constant dense<0.000000e+00> : vector<8x896xf32>
    %51 = tpu.matmul %49, %50, %cst_39 {dimension_numbers = #tpu.dot_dimension_numbers<[1], [0], [0], [1], [0, 0, 1, 1], [], []>} : vector<8x256xbf16>, vector<256x896xbf16>, vector<8x896xf32> -> vector<8x896xf32>
    %c0_40 = arith.constant 0 : index
    %c0_41 = arith.constant 0 : index
    %52 = vector.load %arg16[%c0_40, %c0_41] : memref<1x896xf32, #tpu.memory_space<vmem>>, vector<1x896xf32>
    %53 = vector.broadcast %52 : vector<1x896xf32> to vector<8x896xf32>
    %54 = arith.addf %51, %53 : vector<8x896xf32>
    %55 = arith.negf %54 : vector<8x896xf32>
    %56 = math.exp %55 : vector<8x896xf32>
    %cst_42 = arith.constant 1.000000e+00 : f32
    %57 = vector.broadcast %cst_42 : f32 to vector<8x896xf32>
    %58 = arith.addf %57, %56 : vector<8x896xf32>
    %59 = arith.divf %57, %58 : vector<8x896xf32>
    %c0_43 = arith.constant 0 : index
    %c0_44 = arith.constant 0 : index
    %60 = vector.load %arg17[%c0_43, %c0_44] : memref<8x896xf32, #tpu.memory_space<vmem>>, vector<8x896xf32>
    tpu.vector_store %arg17[%c0_43, %c0_44], %59 {strides = array<i32>} : memref<8x896xf32, #tpu.memory_space<vmem>>, vector<8x896xf32>,
    %c0_45 = arith.constant 0 : index
    %c0_46 = arith.constant 0 : index
    %61 = vector.load %arg18[%c0_45, %c0_46] : memref<8x128xf32, #tpu.memory_space<vmem>>, vector<8x128xf32>
    tpu.vector_store %arg18[%c0_45, %c0_46], %21 {strides = array<i32>} : memref<8x128xf32, #tpu.memory_space<vmem>>, vector<8x128xf32>,
    %c0_47 = arith.constant 0 : index
    %c0_48 = arith.constant 0 : index
    %62 = vector.load %arg19[%c0_47, %c0_48] : memref<8x128xf32, #tpu.memory_space<vmem>>, vector<8x128xf32>
    tpu.vector_store %arg19[%c0_47, %c0_48], %26 {strides = array<i32>} : memref<8x128xf32, #tpu.memory_space<vmem>>, vector<8x128xf32>,
    %c0_49 = arith.constant 0 : index
    %c0_50 = arith.constant 0 : index
    %63 = vector.load %arg20[%c0_49, %c0_50] : memref<8x128xf32, #tpu.memory_space<vmem>>, vector<8x128xf32>
    tpu.vector_store %arg20[%c0_49, %c0_50], %32 {strides = array<i32>} : memref<8x128xf32, #tpu.memory_space<vmem>>, vector<8x128xf32>,
    return
  }
  func.func @transform_0(%arg0: i32) -> (i32, i32) {
    %c0_i32 = arith.constant 0 : i32
    %c0_i32_0 = arith.constant 0 : i32
    return %arg0, %c0_i32 : i32, i32
  }
  func.func @transform_1(%arg0: i32) -> (i32, i32) {
    %c0_i32 = arith.constant 0 : i32
    %c0_i32_0 = arith.constant 0 : i32
    return %arg0, %c0_i32 : i32, i32
  }
  func.func @transform_2(%arg0: i32) -> (i32, i32) {
    %c0_i32 = arith.constant 0 : i32
    %c0_i32_0 = arith.constant 0 : i32
    %c0_i32_1 = arith.constant 0 : i32
    return %c0_i32, %c0_i32_0 : i32, i32
  }
  func.func @transform_3(%arg0: i32) -> (i32, i32) {
    %c0_i32 = arith.constant 0 : i32
    %c0_i32_0 = arith.constant 0 : i32
    %c0_i32_1 = arith.constant 0 : i32
    return %c0_i32, %c0_i32_0 : i32, i32
  }
  func.func @transform_4(%arg0: i32) -> (i32, i32) {
    %c0_i32 = arith.constant 0 : i32
    %c0_i32_0 = arith.constant 0 : i32
    %c0_i32_1 = arith.constant 0 : i32
    return %c0_i32, %c0_i32_0 : i32, i32
  }
  func.func @transform_5(%arg0: i32) -> (i32, i32) {
    %c0_i32 = arith.constant 0 : i32
    %c0_i32_0 = arith.constant 0 : i32
    %c0_i32_1 = arith.constant 0 : i32
    return %c0_i32, %c0_i32_0 : i32, i32
  }
  func.func @transform_6(%arg0: i32) -> (i32, i32) {
    %c0_i32 = arith.constant 0 : i32
    %c0_i32_0 = arith.constant 0 : i32
    %c0_i32_1 = arith.constant 0 : i32
    return %c0_i32, %c0_i32_0 : i32, i32
  }
  func.func @transform_7(%arg0: i32) -> (i32, i32) {
    %c0_i32 = arith.constant 0 : i32
    %c0_i32_0 = arith.constant 0 : i32
    %c0_i32_1 = arith.constant 0 : i32
    return %c0_i32, %c0_i32_0 : i32, i32
  }
  func.func @transform_8(%arg0: i32) -> (i32, i32) {
    %c0_i32 = arith.constant 0 : i32
    %c0_i32_0 = arith.constant 0 : i32
    %c0_i32_1 = arith.constant 0 : i32
    return %c0_i32, %c0_i32_0 : i32, i32
  }
  func.func @transform_9(%arg0: i32) -> (i32, i32) {
    %c0_i32 = arith.constant 0 : i32
    %c0_i32_0 = arith.constant 0 : i32
    %c0_i32_1 = arith.constant 0 : i32
    return %c0_i32, %c0_i32_0 : i32, i32
  }
  func.func @transform_10(%arg0: i32) -> (i32, i32) {
    %c0_i32 = arith.constant 0 : i32
    %c0_i32_0 = arith.constant 0 : i32
    %c0_i32_1 = arith.constant 0 : i32
    return %c0_i32, %c0_i32_0 : i32, i32
  }
  func.func @transform_11(%arg0: i32) -> (i32, i32) {
    %c0_i32 = arith.constant 0 : i32
    %c0_i32_0 = arith.constant 0 : i32
    %c0_i32_1 = arith.constant 0 : i32
    return %c0_i32, %c0_i32_0 : i32, i32
  }
  func.func @transform_12(%arg0: i32) -> (i32, i32) {
    %c0_i32 = arith.constant 0 : i32
    %c0_i32_0 = arith.constant 0 : i32
    %c0_i32_1 = arith.constant 0 : i32
    return %c0_i32, %c0_i32_0 : i32, i32
  }
  func.func @transform_13(%arg0: i32) -> (i32, i32) {
    %c0_i32 = arith.constant 0 : i32
    %c0_i32_0 = arith.constant 0 : i32
    %c0_i32_1 = arith.constant 0 : i32
    return %c0_i32, %c0_i32_0 : i32, i32
  }
  func.func @transform_14(%arg0: i32) -> (i32, i32) {
    %c0_i32 = arith.constant 0 : i32
    %c0_i32_0 = arith.constant 0 : i32
    %c0_i32_1 = arith.constant 0 : i32
    return %c0_i32, %c0_i32_0 : i32, i32
  }
  func.func @transform_15(%arg0: i32) -> (i32, i32) {
    %c0_i32 = arith.constant 0 : i32
    %c0_i32_0 = arith.constant 0 : i32
    %c0_i32_1 = arith.constant 0 : i32
    return %c0_i32, %c0_i32_0 : i32, i32
  }
  func.func @transform_16(%arg0: i32) -> (i32, i32) {
    %c0_i32 = arith.constant 0 : i32
    %c0_i32_0 = arith.constant 0 : i32
    return %arg0, %c0_i32 : i32, i32
  }
  func.func @transform_17(%arg0: i32) -> (i32, i32) {
    %c0_i32 = arith.constant 0 : i32
    %c0_i32_0 = arith.constant 0 : i32
    return %arg0, %c0_i32 : i32, i32
  }
  func.func @transform_18(%arg0: i32) -> (i32, i32) {
    %c0_i32 = arith.constant 0 : i32
    %c0_i32_0 = arith.constant 0 : i32
    return %arg0, %c0_i32 : i32, i32
  }
  func.func @transform_19(%arg0: i32) -> (i32, i32) {
    %c0_i32 = arith.constant 0 : i32
    %c0_i32_0 = arith.constant 0 : i32
    return %arg0, %c0_i32 : i32, i32
  }
}

</mosaic_0001>

<bundles_post_ra>
// kernel: tpu_custom_call.1
= control target key start
LH: loop header
LB: loop body
LE: loop exit
PB: predicated region body
PF: predicated region fallthrough
CT: control target
= control target key end

     0   :  { %s4337_s0 = inlined_call_operand.hbm [shape: bf16[8,896], index: 0, kind: input, shape index: {}]   ;;  %s4338_s1 = inlined_call_operand.hbm [shape: f32[8,128], index: 1, kind: input, shape index: {}]   ;;  %s4339_s2 = inlined_call_operand.hbm [shape: bf16[896,256], index: 2, kind: input, shape index: {}]   ;;  %s4340_s3 = inlined_call_operand.vmem [shape: f32[1,256], index: 3, kind: input, shape index: {}]   ;;  %s4341_s4 = inlined_call_operand.hbm [shape: bf16[256,128], index: 4, kind: input, shape index: {}]   ;;  %s4342_s5 = inlined_call_operand.vmem [shape: f32[1,128], index: 5, kind: input, shape index: {}]   ;;  %s4343_s6 = inlined_call_operand.hbm [shape: bf16[128,128], index: 6, kind: input, shape index: {}]   ;;  %s4344_s7 = inlined_call_operand.vmem [shape: f32[1,128], index: 7, kind: input, shape index: {}]   ;;  %s4345_s8 = inlined_call_operand.hbm [shape: bf16[128,128], index: 8, kind: input, shape index: {}]   ;;  %s4346_s9 = inlined_call_operand.vmem [shape: f32[1,128], index: 9, kind: input, shape index: {}]   ;;  %s4347_s10 = inlined_call_operand.hbm [shape: bf16[128,128], index: 10, kind: input, shape index: {}]   ;;  %s4348_s11 = inlined_call_operand.vmem [shape: f32[1,128], index: 11, kind: input, shape index: {}]   ;;  %s4349_s12 = inlined_call_operand.hbm [shape: bf16[128,256], index: 12, kind: input, shape index: {}]   ;;  %s4350_s13 = inlined_call_operand.vmem [shape: f32[1,256], index: 13, kind: input, shape index: {}]   ;;  %s4351_s14 = inlined_call_operand.hbm [shape: bf16[256,896], index: 14, kind: input, shape index: {}]   ;;  %s4352_s15 = inlined_call_operand.vmem [shape: f32[1,896], index: 15, kind: input, shape index: {}]   ;;  %s4353_s16 = inlined_call_operand.hbm [shape: f32[8,896], index: 16, kind: output, shape index: {0}]   ;;  %s4354_s17 = inlined_call_operand.hbm [shape: f32[8,128], index: 17, kind: output, shape index: {1}]   ;;  %s4355_s18 = inlined_call_operand.hbm [shape: f32[8,128], index: 18, kind: output, shape index: {2}]   ;;  %s4356_s19 = inlined_call_operand.hbm [shape: f32[8,128], index: 19, kind: output, shape index: {3}]  }
   0x1   :  { %4364 = sst [smem:[#allocation31_spill]] %s4337_s0 }
   0x2   :  { %4365 = sst [smem:[#allocation32_spill]] %s4338_s1 }
   0x3   :  { %4366 = sst [smem:[#allocation33_spill]] %s4339_s2 }
   0x4   :  { %4367 = sst [smem:[#allocation34_spill]] %s4340_s3 }
   0x5   :  { %25 = vsyncpa [#allocation3], 0 }
   0x6   :  { %26 = vsyncpa [#allocation6], 0 }
   0x7   :  { %27 = vsyncpa [#allocation9], 0 }
   0x8   :  { %28 = vsyncpa [#allocation12], 0 }
   0x9   :  { %29 = vsyncpa [#allocation15], 0 }
   0xa   :  { %30 = vsyncpa [#allocation4], 0 }
   0xb   :  { %31 = vsyncpa [#allocation19], 0 }
   0xc   :  { %32 = vsyncpa [#allocation22], 0  ;;  %s3944_s0 = smov [#allocation5]   ;;  %s3945_s20 = smov [#allocation8]  }
   0xd   :  { %s49_s30 = sshll.u32 %s3944_s0, 4  ;;  %s72_s21 = sshll.u32 %s3945_s20, 4  ;;  %s50_s30 = int_to_ptr.vmem [resolvable:$true] %s49_s30  ;;  %s4066_s21 = int_to_ptr.vmem [resolvable:$true] %s72_s21 }
   0xe   :  { %s4368_s2 = sld [smem:[#allocation32_spill]] }
  0x14   :  { %s3642_s23 = scalar_lea.hbm %s4368_s2, 128 }
  0x15   :  { %p3643_p0 = scmp.ne.s32.totalorder %s4368_s2, %s3642_s23  ;;  %p3646_p1 = scmp.lt.u32.totalorder %s3642_s23, %s4368_s2 }
  0x17   :  { %p3648_p2 = pnand %p3646_p1, %p3643_p0 }
  0x19   :  { %3651 = shalt.err (!%p3648_p2)
}
  0x1a   :  { %s3652_s27 = scalar_lea.vmem %s50_s30, 128  ;;  %p3657_p4 = scmp.lt.s32.totalorder %s50_s30, %s50_s30 }
  0x1b   :  { %p3653_p3 = scmp.ne.s32.totalorder %s50_s30, %s3652_s27  ;;  %p3658_p5 = scmp.lt.s32.totalorder %s3652_s27, %s3652_s27 }
  0x1d   :  { %p3659_p6 = por %p3658_p5, %p3657_p4 }
  0x1f   :  { %p3660_p7 = pnand %p3659_p6, %p3653_p3 }
  0x21   :  { %3663 = shalt.err (!%p3660_p7)
}
  0x22   :  { %52 = dma.hbm_to_vmem [thread:$0]  %s4368_s2, 128, %s50_s30, [#allocation6]  }
  0x23   :  { %s3664_s1 = scalar_lea.hbm %s4341_s4, 2048 }
  0x24   :  { %p3665_p8 = scmp.ne.s32.totalorder %s4341_s4, %s3664_s1  ;;  %p3668_p9 = scmp.lt.u32.totalorder %s3664_s1, %s4341_s4 }
  0x26   :  { %p3670_p10 = pnand %p3668_p9, %p3665_p8 }
  0x28   :  { %3673 = shalt.err (!%p3670_p10)
}
  0x29   :  { %s3674_s3 = scalar_lea.vmem %s4066_s21, 2048  ;;  %p3679_p12 = scmp.lt.s32.totalorder %s4066_s21, %s4066_s21 }
  0x2a   :  { %p3675_p11 = scmp.ne.s32.totalorder %s4066_s21, %s3674_s3  ;;  %p3680_p13 = scmp.lt.s32.totalorder %s3674_s3, %s3674_s3 }
  0x2c   :  { %p3681_p0 = por %p3680_p13, %p3679_p12 }
  0x2e   :  { %p3682_p1 = pnand %p3681_p0, %p3675_p11 }
  0x30   :  { %3685 = shalt.err (!%p3682_p1)
}
  0x31   :  { %s4360_s30 = smov 64   ;;  %s4362_s2 = smov 4  }
  0x32   :  { %78 = dma.hbm_to_vmem [thread:$0]  %s4341_s4, 2048, %s4066_s21, [#allocation9], %s4360_s30, %s4360_s30, %s4362_s2  }
  0x33   :  { %s3948_s28 = smov [#allocation11]   ;;  %s3686_s1 = scalar_lea.hbm %s4345_s8, 1024 }
  0x34   :  { %s100_s29 = sshll.u32 %s3948_s28, 4  ;;  %p3687_p2 = scmp.ne.s32.totalorder %s4345_s8, %s3686_s1  ;;  %s101_s29 = int_to_ptr.vmem [resolvable:$true] %s100_s29 }
  0x35   :  { %p3690_p3 = scmp.lt.u32.totalorder %s3686_s1, %s4345_s8 }
  0x37   :  { %p3692_p4 = pnand %p3690_p3, %p3687_p2 }
  0x39   :  { %3695 = shalt.err (!%p3692_p4)
}
  0x3a   :  { %s3696_s3 = scalar_lea.vmem %s101_s29, 1024  ;;  %p3701_p6 = scmp.lt.s32.totalorder %s101_s29, %s101_s29 }
  0x3b   :  { %p3697_p5 = scmp.ne.s32.totalorder %s101_s29, %s3696_s3  ;;  %p3702_p7 = scmp.lt.s32.totalorder %s3696_s3, %s3696_s3 }
  0x3d   :  { %p3703_p8 = por %p3702_p7, %p3701_p6 }
  0x3f   :  { %p3704_p9 = pnand %p3703_p8, %p3697_p5 }
  0x41   :  { %3707 = shalt.err (!%p3704_p9)
}
  0x42   :  { %106 = dma.hbm_to_vmem [thread:$0]  %s4345_s8, 1024, %s101_s29, [#allocation12], %s4360_s30, %s4360_s30, %s4362_s2  }
  0x43   :  { %s3949_s26 = smov [#allocation14]   ;;  %s3950_s28 = smov [#allocation2]  }
  0x44   :  { %s128_s27 = sshll.u32 %s3949_s26, 4  ;;  %s39_s0 = sshll.u32 %s3950_s28, 4  ;;  %s129_s27 = int_to_ptr.vmem [resolvable:$true] %s128_s27  ;;  %s40_s0 = int_to_ptr.vmem [resolvable:$true] %s39_s0 }
  0x45   :  { %s3708_s22 = scalar_lea.hbm %s4349_s12, 2048 }
  0x46   :  { %p3709_p10 = scmp.ne.s32.totalorder %s4349_s12, %s3708_s22  ;;  %p3712_p11 = scmp.lt.u32.totalorder %s3708_s22, %s4349_s12 }
  0x48   :  { %p3714_p12 = pnand %p3712_p11, %p3709_p10 }
  0x4a   :  { %3717 = shalt.err (!%p3714_p12)
}
  0x4b   :  { %s3718_s8 = scalar_lea.vmem %s129_s27, 2048  ;;  %p3723_p0 = scmp.lt.s32.totalorder %s129_s27, %s129_s27 }
  0x4c   :  { %p3719_p13 = scmp.ne.s32.totalorder %s129_s27, %s3718_s8  ;;  %p3724_p1 = scmp.lt.s32.totalorder %s3718_s8, %s3718_s8 }
  0x4e   :  { %p3725_p2 = por %p3724_p1, %p3723_p0 }
  0x50   :  { %p3726_p3 = pnand %p3725_p2, %p3719_p13 }
  0x52   :  { %3729 = shalt.err (!%p3726_p3)
}
  0x53   :  { %s3951_s29 = smov 128   ;;  %s3952_s4 = smov 8  }
  0x54   :  { %134 = dma.hbm_to_vmem [thread:$0]  %s4349_s12, 2048, %s129_s27, [#allocation15], %s3951_s29, %s3951_s29, %s3952_s4  }
  0x55   :  { %s4369_s1 = sld [smem:[#allocation31_spill]] }
  0x5b   :  { %s3730_s22 = scalar_lea.hbm %s4369_s1, 448 }
  0x5c   :  { %p3731_p4 = scmp.ne.s32.totalorder %s4369_s1, %s3730_s22  ;;  %p3734_p5 = scmp.lt.u32.totalorder %s3730_s22, %s4369_s1 }
  0x5e   :  { %p3736_p6 = pnand %p3734_p5, %p3731_p4 }
  0x60   :  { %3739 = shalt.err (!%p3736_p6)
}
  0x61   :  { %s3740_s8 = scalar_lea.vmem %s40_s0, 448  ;;  %p3745_p8 = scmp.lt.s32.totalorder %s40_s0, %s40_s0 }
  0x62   :  { %p3741_p7 = scmp.ne.s32.totalorder %s40_s0, %s3740_s8  ;;  %p3746_p9 = scmp.lt.s32.totalorder %s3740_s8, %s3740_s8 }
  0x64   :  { %p3747_p10 = por %p3746_p9, %p3745_p8 }
  0x66   :  { %p3748_p11 = pnand %p3747_p10, %p3741_p7 }
  0x68   :  { %3751 = shalt.err (!%p3748_p11)
}
  0x69   :  { %42 = dma.hbm_to_vmem [thread:$0]  %s4369_s1, 448, %s40_s0, [#allocation3]  }
  0x6a   :  { %s3953_s21 = smov [#allocation7]   ;;  %s3954_s28 = smov [#allocation10]  }
  0x6b   :  { %s58_s26 = sshll.u32 %s3953_s21, 4  ;;  %s86_s20 = sshll.u32 %s3954_s28, 4  ;;  %s59_s26 = int_to_ptr.vmem [resolvable:$true] %s58_s26  ;;  %s87_s20 = int_to_ptr.vmem [resolvable:$true] %s86_s20 }
  0x6c   :  { %s4370_s23 = sld [smem:[#allocation33_spill]] }
  0x72   :  { %s3752_s25 = scalar_lea.hbm %s4370_s23, 14336 }
  0x73   :  { %p3753_p12 = scmp.ne.s32.totalorder %s4370_s23, %s3752_s25  ;;  %p3756_p13 = scmp.lt.u32.totalorder %s3752_s25, %s4370_s23 }
  0x75   :  { %p3758_p0 = pnand %p3756_p13, %p3753_p12 }
  0x77   :  { %3761 = shalt.err (!%p3758_p0)
}
  0x78   :  { %s3762_s0 = scalar_lea.vmem %s59_s26, 14336  ;;  %p3767_p2 = scmp.lt.s32.totalorder %s59_s26, %s59_s26 }
  0x79   :  { %p3763_p1 = scmp.ne.s32.totalorder %s59_s26, %s3762_s0  ;;  %p3768_p3 = scmp.lt.s32.totalorder %s3762_s0, %s3762_s0 }
  0x7b   :  { %p3769_p4 = por %p3768_p3, %p3767_p2 }
  0x7d   :  { %p3770_p5 = pnand %p3769_p4, %p3763_p1 }
  0x7f   :  { %3773 = shalt.err (!%p3770_p5)
}
  0x80   :  { %64 = dma.hbm_to_vmem [thread:$0]  %s4370_s23, 14336, %s59_s26, [#allocation6], %s3951_s29, %s3951_s29, %s3952_s4  }
  0x81   :  { %s3774_s27 = scalar_lea.hbm %s4343_s6, 1024 }
  0x82   :  { %p3775_p6 = scmp.ne.s32.totalorder %s4343_s6, %s3774_s27  ;;  %p3778_p7 = scmp.lt.u32.totalorder %s3774_s27, %s4343_s6 }
  0x84   :  { %p3780_p8 = pnand %p3778_p7, %p3775_p6 }
  0x86   :  { %3783 = shalt.err (!%p3780_p8)
}
  0x87   :  { %s3784_s25 = scalar_lea.vmem %s87_s20, 1024  ;;  %p3789_p10 = scmp.lt.s32.totalorder %s87_s20, %s87_s20 }
  0x88   :  { %p3785_p9 = scmp.ne.s32.totalorder %s87_s20, %s3784_s25  ;;  %p3790_p11 = scmp.lt.s32.totalorder %s3784_s25, %s3784_s25 }
  0x8a   :  { %p3791_p12 = por %p3790_p11, %p3789_p10 }
  0x8c   :  { %p3792_p13 = pnand %p3791_p12, %p3785_p9 }
  0x8e   :  { %3795 = shalt.err (!%p3792_p13)
}
  0x8f   :  { %s4371_s29 = smov 4   ;;  %s4372_s4 = smov 64  }
  0x90   :  { %92 = dma.hbm_to_vmem [thread:$0]  %s4343_s6, 1024, %s87_s20, [#allocation9], %s4372_s4, %s4372_s4, %s4371_s29  }
  0x91   :  { %s3955_s3 = smov [#allocation13]   ;;  %s3956_s0 = smov [#allocation16]  }
  0x92   :  { %s114_s8 = sshll.u32 %s3955_s3, 4  ;;  %s142_s1 = sshll.u32 %s3956_s0, 4  ;;  %s115_s8 = int_to_ptr.vmem [resolvable:$true] %s114_s8  ;;  %s143_s1 = int_to_ptr.vmem [resolvable:$true] %s142_s1 }
  0x93   :  { %s3796_s2 = scalar_lea.hbm %s4347_s10, 1024 }
  0x94   :  { %p3797_p0 = scmp.ne.s32.totalorder %s4347_s10, %s3796_s2  ;;  %p3800_p1 = scmp.lt.u32.totalorder %s3796_s2, %s4347_s10 }
  0x96   :  { %p3802_p2 = pnand %p3800_p1, %p3797_p0 }
  0x98   :  { %3805 = shalt.err (!%p3802_p2)
}
  0x99   :  { %s3806_s6 = scalar_lea.vmem %s115_s8, 1024  ;;  %p3811_p4 = scmp.lt.s32.totalorder %s115_s8, %s115_s8 }
  0x9a   :  { %p3807_p3 = scmp.ne.s32.totalorder %s115_s8, %s3806_s6  ;;  %p3812_p5 = scmp.lt.s32.totalorder %s3806_s6, %s3806_s6 }
  0x9c   :  { %p3813_p6 = por %p3812_p5, %p3811_p4 }
  0x9e   :  { %p3814_p7 = pnand %p3813_p6, %p3807_p3 }
  0xa0   :  { %3817 = shalt.err (!%p3814_p7)
}
  0xa1   :  { %120 = dma.hbm_to_vmem [thread:$0]  %s4347_s10, 1024, %s115_s8, [#allocation12], %s4372_s4, %s4372_s4, %s4371_s29  }
  0xa2   :  { %s3818_s23 = scalar_lea.hbm %s4351_s14, 14336 }
  0xa3   :  { %p3819_p8 = scmp.ne.s32.totalorder %s4351_s14, %s3818_s23  ;;  %p3822_p9 = scmp.lt.u32.totalorder %s3818_s23, %s4351_s14 }
  0xa5   :  { %p3824_p10 = pnand %p3822_p9, %p3819_p8 }
  0xa7   :  { %3827 = shalt.err (!%p3824_p10)
}
  0xa8   :  { %s3828_s2 = scalar_lea.vmem %s143_s1, 14336  ;;  %p3833_p12 = scmp.lt.s32.totalorder %s143_s1, %s143_s1 }
  0xa9   :  { %p3829_p11 = scmp.ne.s32.totalorder %s143_s1, %s3828_s2  ;;  %p3834_p13 = scmp.lt.s32.totalorder %s3828_s2, %s3828_s2 }
  0xab   :  { %p3835_p0 = por %p3834_p13, %p3833_p12 }
  0xad   :  { %p3836_p1 = pnand %p3835_p0, %p3829_p11 }
  0xaf   :  { %3839 = shalt.err (!%p3836_p1)
}
  0xb0   :  { %s3957_s10 = smov 448   ;;  %s3958_s29 = smov 28  }
  0xb1   :  { %148 = dma.hbm_to_vmem [thread:$0]  %s4351_s14, 14336, %s143_s1, [#allocation15], %s3957_s10, %s3957_s10, %s3958_s29  }
  0xb2   :  { %3928 = dma.done.wait [#allocation3], 448  }
  0xb3   :  { %3929 = vsyncadd [#allocation3], 4294966848 }
  0xb4   :  { %3930 = dma.done.wait [#allocation6], 14464  }
  0xb5   :  { %3931 = vsyncadd [#allocation6], 4294952832 }
  0xb6   :  { %3932 = dma.done.wait [#allocation9], 3072  }
  0xb7   :  { %3933 = vsyncadd [#allocation9], 4294964224 }
  0xb8   :  { %3934 = dma.done.wait [#allocation12], 2048  }
  0xb9   :  { %3935 = vsyncadd [#allocation12], 4294965248 }
  0xba   :  { %3936 = dma.done.wait [#allocation15], 16384  }
  0xbb   :  { %3937 = vsyncadd [#allocation15], 4294950912  ;;  %v3213_v0 = vld [vmem:[#allocation7 + $0x4] ss:$8 sps:$4 sm:$0xff]   ;;  %v3215_v1 = vld [vmem:[#allocation7] ss:$8 sps:$4 sm:$0xff]  }
  0xbc   :  { %892 = vmatprep.subr.bf16.mxu0 %v3213_v0  ;;  %v3216_v2 = vld [vmem:[#allocation7 + $0x14] ss:$8 sps:$4 sm:$0xff]   ;;  %v3218_v3 = vld [vmem:[#allocation7 + $0x10] ss:$8 sps:$4 sm:$0xff]   ;;  %v3219_v4 = vld [vmem:[#allocation7 + $0x24] ss:$8 sps:$4 sm:$0xff]  }
  0xbd   :  { %893 = vmatpush1.bf16.msra.mxu0 %v3215_v1  ;;  %v3221_v5 = vld [vmem:[#allocation7 + $0x20] ss:$8 sps:$4 sm:$0xff]   ;;  %v3222_v6 = vld [vmem:[#allocation7 + $0x34] ss:$8 sps:$4 sm:$0xff]   ;;  %v3224_v7 = vld [vmem:[#allocation7 + $0x30] ss:$8 sps:$4 sm:$0xff]  }
  0xbe   :  { %894 = vmatprep.subr.bf16.mxu0 %v3216_v2  ;;  %v3225_v8 = vld [vmem:[#allocation7 + $0x44] ss:$8 sps:$4 sm:$0xff]   ;;  %v3227_v9 = vld [vmem:[#allocation7 + $0x40] ss:$8 sps:$4 sm:$0xff]   ;;  %v3228_v10 = vld [vmem:[#allocation7 + $0x54] ss:$8 sps:$4 sm:$0xff]  }
  0xbf   :  { %v3230_v11 = vld [vmem:[#allocation7 + $0x50] ss:$8 sps:$4 sm:$0xff]   ;;  %v3231_v12 = vld [vmem:[#allocation7 + $0x64] ss:$8 sps:$4 sm:$0xff]   ;;  %v179_v13 = vld [vmem:[#allocation2] sm:$0xff]  ;;  %s4373_s27 = sld [smem:[#allocation34_spill]] }
  0xc0   :  { %v2749_v14 = vcombine.high %v179_v13, %v179_v13  ;;  %v3233_v15 = vld [vmem:[#allocation7 + $0x60] ss:$8 sps:$4 sm:$0xff]   ;;  %v3234_v16 = vld [vmem:[#allocation7 + $0x74] ss:$8 sps:$4 sm:$0xff]   ;;  %v3236_v17 = vld [vmem:[#allocation7 + $0x70] ss:$8 sps:$4 sm:$0xff]   ;;  %v2748_v36 = vcombine.low %v179_v13, %v179_v13 }
  0xc1   :  { %895 = vmatpush1.bf16.msra.mxu0 %v3218_v3  ;;  %v3237_v18 = vld [vmem:[#allocation7 + $0x84] ss:$8 sps:$4 sm:$0xff]   ;;  %v3239_v19 = vld [vmem:[#allocation7 + $0x80] ss:$8 sps:$4 sm:$0xff]   ;;  %v3240_v20 = vld [vmem:[#allocation7 + $0x94] ss:$8 sps:$4 sm:$0xff]  }
  0xc2   :  { %896 = vmatprep.subr.bf16.mxu0 %v3219_v4  ;;  %924 = vmatprep.mubr.bf16.mxu0 %v2749_v14  ;;  %v3242_v21 = vld [vmem:[#allocation7 + $0x90] ss:$8 sps:$4 sm:$0xff]   ;;  %v3243_v22 = vld [vmem:[#allocation7 + $0xa4] ss:$8 sps:$4 sm:$0xff]   ;;  %v3245_v23 = vld [vmem:[#allocation7 + $0xa0] ss:$8 sps:$4 sm:$0xff]  }
  0xc3   :  { %v3246_v24 = vld [vmem:[#allocation7 + $0xb4] ss:$8 sps:$4 sm:$0xff]   ;;  %v3248_v25 = vld [vmem:[#allocation7 + $0xb0] ss:$8 sps:$4 sm:$0xff]   ;;  %v3249_v26 = vld [vmem:[#allocation7 + $0xc4] ss:$8 sps:$4 sm:$0xff]  }
  0xc4   :  { %v3251_v27 = vld [vmem:[#allocation7 + $0xc0] ss:$8 sps:$4 sm:$0xff]   ;;  %v3252_v28 = vld [vmem:[#allocation7 + $0xd4] ss:$8 sps:$4 sm:$0xff]   ;;  %v3254_v29 = vld [vmem:[#allocation7 + $0xd0] ss:$8 sps:$4 sm:$0xff]  }
  0xc5   :  { %897 = vmatpush1.bf16.msra.mxu0 %v3221_v5  ;;  %v3255_v30 = vld [vmem:[#allocation7 + $0xe4] ss:$8 sps:$4 sm:$0xff]   ;;  %v3257_v31 = vld [vmem:[#allocation7 + $0xe0] ss:$8 sps:$4 sm:$0xff]   ;;  %v3258_v32 = vld [vmem:[#allocation7 + $0xf4] ss:$8 sps:$4 sm:$0xff]  }
  0xc6   :  { %898 = vmatprep.subr.bf16.mxu0 %v3222_v6  ;;  %v3260_v33 = vld [vmem:[#allocation7 + $0xf0] ss:$8 sps:$4 sm:$0xff]   ;;  %v3265_v34 = vld [vmem:[#allocation7 + $0x104] ss:$8 sps:$4 sm:$0xff]   ;;  %v3263_v37 = vld [vmem:[#allocation7 + $0x100] ss:$8 sps:$4 sm:$0xff]  }
  0xc7   :  { %v4199_v35 = vld [vmem:[#allocation2 + $0x8] sm:$0xff]  ;;  %v3268_v39 = vld [vmem:[#allocation7 + $0x114] ss:$8 sps:$4 sm:$0xff]   ;;  %v3266_v40 = vld [vmem:[#allocation7 + $0x110] ss:$8 sps:$4 sm:$0xff]   ;;  %vm3961_vm0 = vmmov 0  }
  0xc8   :  { %v2751_v38 = vcombine.high %v4199_v35, %v4199_v35  ;;  %v3271_v41 = vld [vmem:[#allocation7 + $0x124] ss:$8 sps:$4 sm:$0xff]   ;;  %v3269_v42 = vld [vmem:[#allocation7 + $0x120] ss:$8 sps:$4 sm:$0xff]   ;;  %v3274_v43 = vld [vmem:[#allocation7 + $0x134] ss:$8 sps:$4 sm:$0xff]  }
  0xc9   :  { %899 = vmatpush1.bf16.msra.mxu0 %v3224_v7  ;;  %v3272_v44 = vld [vmem:[#allocation7 + $0x130] ss:$8 sps:$4 sm:$0xff]   ;;  %v3277_v45 = vld [vmem:[#allocation7 + $0x144] ss:$8 sps:$4 sm:$0xff]   ;;  %v3275_v46 = vld [vmem:[#allocation7 + $0x140] ss:$8 sps:$4 sm:$0xff]  }
  0xca   :  { %900 = vmatprep.subr.bf16.mxu0 %v3225_v8  ;;  %v3280_v47 = vld [vmem:[#allocation7 + $0x154] ss:$8 sps:$4 sm:$0xff]   ;;  %v3278_v48 = vld [vmem:[#allocation7 + $0x150] ss:$8 sps:$4 sm:$0xff]   ;;  %v3283_v49 = vld [vmem:[#allocation7 + $0x164] ss:$8 sps:$4 sm:$0xff]  }
  0xcb   :  { %v3281_v50 = vld [vmem:[#allocation7 + $0x160] ss:$8 sps:$4 sm:$0xff]   ;;  %v3286_v51 = vld [vmem:[#allocation7 + $0x174] ss:$8 sps:$4 sm:$0xff]   ;;  %v3284_v52 = vld [vmem:[#allocation7 + $0x170] ss:$8 sps:$4 sm:$0xff]  }
  0xcc   :  { %v3289_v53 = vld [vmem:[#allocation7 + $0x184] ss:$8 sps:$4 sm:$0xff]   ;;  %v3287_v54 = vld [vmem:[#allocation7 + $0x180] ss:$8 sps:$4 sm:$0xff]   ;;  %v3292_v55 = vld [vmem:[#allocation7 + $0x194] ss:$8 sps:$4 sm:$0xff]  }
  0xcd   :  { %901 = vmatpush1.bf16.msra.mxu0 %v3227_v9  ;;  %v3388_v56 = vld [vmem:[#allocation8 + $0x40] sm:$0xff]   ;;  %v3390_v58 = vld [vmem:[#allocation8 + $0x48] sm:$0xff]   ;;  %v3290_v59 = vld [vmem:[#allocation7 + $0x190] ss:$8 sps:$4 sm:$0xff]  }
  0xce   :  { %902 = vmatprep.subr.bf16.mxu0 %v3228_v10  ;;  %v3389_v57 = vld [vmem:[#allocation8] sm:$0xff]   ;;  %3046 = vmatprep.subr.bf16.mxu1 %v3388_v56  ;;  %v3391_v62 = vld [vmem:[#allocation8 + $0x8] sm:$0xff]   ;;  %v3298_v63 = vld [vmem:[#allocation7 + $0x1b4] ss:$8 sps:$4 sm:$0xff]  }
  0xcf   :  { %v3295_v60 = vld [vmem:[#allocation7 + $0x1a4] ss:$8 sps:$4 sm:$0xff]   ;;  %v3293_v61 = vld [vmem:[#allocation7 + $0x1a0] ss:$8 sps:$4 sm:$0xff]   ;;  %3047 = vmatpush3.bf16.msra.mxu1 %v3389_v57  ;;  %v3392_v0 = vld [vmem:[#allocation8 + $0x50] sm:$0xff]   ;;  %v3959_v57 = vmov 0  }
  0xd0   :  { %3048 = vmatprep.subr.bf16.mxu1 %v3390_v58  ;;  %v3393_v1 = vld [vmem:[#allocation8 + $0x10] sm:$0xff]   ;;  %v3394_v2 = vld [vmem:[#allocation8 + $0x58] sm:$0xff]   ;;  %v3301_v4 = vld [vmem:[#allocation7 + $0x1c4] ss:$8 sps:$4 sm:$0xff]  }
  0xd1   :  { %903 = vmatpush1.bf16.msra.mxu0 %v3230_v11  ;;  %v3296_v3 = vld [vmem:[#allocation7 + $0x1b0] ss:$8 sps:$4 sm:$0xff]   ;;  %v3396_v6 = vld [vmem:[#allocation8 + $0x60] sm:$0xff]   ;;  %v3304_v8 = vld [vmem:[#allocation7 + $0x1d4] ss:$8 sps:$4 sm:$0xff]  }
  0xd2   :  { %904 = vmatprep.subr.bf16.mxu0 %v3231_v12  ;;  %v3395_v5 = vld [vmem:[#allocation8 + $0x18] sm:$0xff]   ;;  %v3299_v7 = vld [vmem:[#allocation7 + $0x1c0] ss:$8 sps:$4 sm:$0xff]   ;;  %v3307_v12 = vld [vmem:[#allocation7 + $0x1e4] ss:$8 sps:$4 sm:$0xff]  }
  0xd3   :  { %3049 = vmatpush3.bf16.msra.mxu1 %v3391_v62  ;;  %v3397_v9 = vld [vmem:[#allocation8 + $0x20] sm:$0xff]   ;;  %v3398_v10 = vld [vmem:[#allocation8 + $0x68] sm:$0xff]   ;;  %v3302_v11 = vld [vmem:[#allocation7 + $0x1d0] ss:$8 sps:$4 sm:$0xff]  }
  0xd4   :  { %3050 = vmatprep.subr.bf16.mxu1 %v3392_v0  ;;  %v3399_v13 = vld [vmem:[#allocation8 + $0x28] sm:$0xff]   ;;  %v3366_v56 = vld [vmem:[#allocation7 + $0x310] ss:$8 sps:$4 sm:$0xff]   ;;  %v3380_v0 = vld [vmem:[#allocation7 + $0x354] ss:$8 sps:$4 sm:$0xff]  }
  0xd5   :  { %905 = vmatpush1.bf16.msra.mxu0 %v3233_v15  ;;  %v3305_v14 = vld [vmem:[#allocation7 + $0x1e0] ss:$8 sps:$4 sm:$0xff]   ;;  %v3310_v15 = vld [vmem:[#allocation7 + $0x1f4] ss:$8 sps:$4 sm:$0xff]   ;;  %v3371_v58 = vld [vmem:[#allocation7 + $0x324] ss:$8 sps:$4 sm:$0xff]  }
  0xd6   :  { %906 = vmatprep.subr.bf16.mxu0 %v3234_v16  ;;  %v3308_v16 = vld [vmem:[#allocation7 + $0x1f0] ss:$8 sps:$4 sm:$0xff]   ;;  %v3377_v62 = vld [vmem:[#allocation7 + $0x344] ss:$8 sps:$4 sm:$0xff]  }
  0xd7   :  { %3051 = vmatpush3.bf16.msra.mxu1 %v3393_v1  ;;  %v3378_v1 = vld [vmem:[#allocation7 + $0x350] ss:$8 sps:$4 sm:$0xff]  }
  0xd8   :  { %3052 = vmatprep.subr.bf16.mxu1 %v3394_v2  ;;  %v3383_v2 = vld [vmem:[#allocation7 + $0x364] ss:$8 sps:$4 sm:$0xff]  }
  0xd9   :  { %907 = vmatpush1.bf16.msra.mxu0 %v3236_v17  ;;  %v3315_v17 = vld [vmem:[#allocation7 + $0x204] ss:$8 sps:$4 sm:$0xff]  }
  0xda   :  { %908 = vmatprep.subr.bf16.mxu0 %v3237_v18  ;;  %v4203_v18 = vld [vmem:[#allocation2 + $0x10] sm:$0xff] }
  0xdb   :  { %3053 = vmatpush3.bf16.msra.mxu1 %v3395_v5  ;;  %v3384_v5 = vld [vmem:[#allocation7 + $0x370] ss:$8 sps:$4 sm:$0xff]  }
  0xdc   :  { %3054 = vmatprep.subr.bf16.mxu1 %v3396_v6  ;;  %v3387_v6 = vld [vmem:[#allocation2 + $0x18] ss:$0 sps:$4 sm:$0xff]  }
  0xdd   :  { %909 = vmatpush1.bf16.msra.mxu0 %v3239_v19  ;;  %v3313_v19 = vld [vmem:[#allocation7 + $0x200] ss:$8 sps:$4 sm:$0xff]  }
  0xde   :  { %910 = vmatprep.subr.bf16.mxu0 %v3240_v20  ;;  %v2750_v20 = vcombine.low %v4199_v35, %v4199_v35  ;;  %v3334_v35 = vld [vmem:[#allocation7 + $0x270] ss:$8 sps:$4 sm:$0xff]  }
  0xdf   :  { %3055 = vmatpush3.bf16.msra.mxu1 %v3397_v9  ;;  %v3402_v9 = vld [vmem:[#allocation8 + $0x78] sm:$0xff]  }
  0xe0   :  { %3056 = vmatprep.subr.bf16.mxu1 %v3398_v10  ;;  %v3403_v10 = vld [vmem:[#allocation8 + $0x38] sm:$0xff]  }
  0xe1   :  { %911 = vmatpush1.bf16.msra.mxu0 %v3242_v21  ;;  %v3318_v21 = vld [vmem:[#allocation7 + $0x214] ss:$8 sps:$4 sm:$0xff]  }
  0xe2   :  { %912 = vmatprep.subr.bf16.mxu0 %v3243_v22  ;;  %v2753_v22 = vcombine.high %v4203_v18, %v4203_v18 }
  0xe3   :  { %3057 = vmatpush3.bf16.msra.mxu1 %v3399_v13 }
  0xe5   :  { %913 = vmatpush1.bf16.msra.mxu0 %v3245_v23  ;;  %v3316_v23 = vld [vmem:[#allocation7 + $0x210] ss:$8 sps:$4 sm:$0xff]  }
  0xe6   :  { %914 = vmatprep.subr.bf16.mxu0 %v3246_v24  ;;  %v3321_v24 = vld [vmem:[#allocation7 + $0x224] ss:$8 sps:$4 sm:$0xff]  }
  0xe9   :  { %915 = vmatpush1.bf16.msra.mxu0 %v3248_v25  ;;  %v3319_v25 = vld [vmem:[#allocation7 + $0x220] ss:$8 sps:$4 sm:$0xff]  }
  0xea   :  { %916 = vmatprep.subr.bf16.mxu0 %v3249_v26  ;;  %v3324_v26 = vld [vmem:[#allocation7 + $0x234] ss:$8 sps:$4 sm:$0xff]  }
  0xed   :  { %917 = vmatpush1.bf16.msra.mxu0 %v3251_v27  ;;  %v3322_v27 = vld [vmem:[#allocation7 + $0x230] ss:$8 sps:$4 sm:$0xff]  }
  0xee   :  { %918 = vmatprep.subr.bf16.mxu0 %v3252_v28  ;;  %v3327_v28 = vld [vmem:[#allocation7 + $0x244] ss:$8 sps:$4 sm:$0xff]  }
  0xf1   :  { %919 = vmatpush1.bf16.msra.mxu0 %v3254_v29  ;;  %v3325_v29 = vld [vmem:[#allocation7 + $0x240] ss:$8 sps:$4 sm:$0xff]  }
  0xf2   :  { %920 = vmatprep.subr.bf16.mxu0 %v3255_v30  ;;  %v3330_v30 = vld [vmem:[#allocation7 + $0x254] ss:$8 sps:$4 sm:$0xff]  }
  0xf5   :  { %921 = vmatpush1.bf16.msra.mxu0 %v3257_v31  ;;  %v3328_v31 = vld [vmem:[#allocation7 + $0x250] ss:$8 sps:$4 sm:$0xff]  }
  0xf6   :  { %922 = vmatprep.subr.bf16.mxu0 %v3258_v32  ;;  %v3333_v32 = vld [vmem:[#allocation7 + $0x264] ss:$8 sps:$4 sm:$0xff]  }
  0xf9   :  { %923 = vmatpush1.bf16.msra.mxu0 %v3260_v33  ;;  %v3331_v33 = vld [vmem:[#allocation7 + $0x260] ss:$8 sps:$4 sm:$0xff]  }
  0xfa   :  { %933 = vmatprep.subr.bf16.mxu0 %v3265_v34  ;;  %v3336_v34 = vld [vmem:[#allocation7 + $0x274] ss:$8 sps:$4 sm:$0xff]  }
  0xfc   :  { %925 = vmatmul.mubr.bf16.vlgmr.msra.gmra.mrb[0].mxu0 %v2748_v36  ;;  %v3339_v36 = vld [vmem:[#allocation7 + $0x284] ss:$8 sps:$4 sm:$0xff]  }
  0xfd   :  { %934 = vmatpush1.bf16.msra.mxu0 %v3263_v37  ;;  %965 = vmatprep.mubr.bf16.mxu0 %v2751_v38  ;;  %v3337_v37 = vld [vmem:[#allocation7 + $0x280] ss:$8 sps:$4 sm:$0xff]   ;;  %v3342_v38 = vld [vmem:[#allocation7 + $0x294] ss:$8 sps:$4 sm:$0xff]  }
  0xfe   :  { %935 = vmatprep.subr.bf16.mxu0 %v3268_v39  ;;  %v3340_v39 = vld [vmem:[#allocation7 + $0x290] ss:$8 sps:$4 sm:$0xff]  }
 0x101   :  { %936 = vmatpush1.bf16.msra.mxu0 %v3266_v40  ;;  %v3345_v40 = vld [vmem:[#allocation7 + $0x2a4] ss:$8 sps:$4 sm:$0xff]  }
 0x102   :  { %937 = vmatprep.subr.bf16.mxu0 %v3271_v41  ;;  %v3343_v41 = vld [vmem:[#allocation7 + $0x2a0] ss:$8 sps:$4 sm:$0xff]  }
 0x105   :  { %938 = vmatpush1.bf16.msra.mxu0 %v3269_v42  ;;  %v3348_v42 = vld [vmem:[#allocation7 + $0x2b4] ss:$8 sps:$4 sm:$0xff]  }
 0x106   :  { %939 = vmatprep.subr.bf16.mxu0 %v3274_v43  ;;  %v3346_v43 = vld [vmem:[#allocation7 + $0x2b0] ss:$8 sps:$4 sm:$0xff]  }
 0x109   :  { %940 = vmatpush1.bf16.msra.mxu0 %v3272_v44  ;;  %v3351_v44 = vld [vmem:[#allocation7 + $0x2c4] ss:$8 sps:$4 sm:$0xff]  }
 0x10a   :  { %941 = vmatprep.subr.bf16.mxu0 %v3277_v45  ;;  %v3349_v45 = vld [vmem:[#allocation7 + $0x2c0] ss:$8 sps:$4 sm:$0xff]  }
 0x10d   :  { %942 = vmatpush1.bf16.msra.mxu0 %v3275_v46  ;;  %v3354_v46 = vld [vmem:[#allocation7 + $0x2d4] ss:$8 sps:$4 sm:$0xff]  }
 0x10e   :  { %943 = vmatprep.subr.bf16.mxu0 %v3280_v47  ;;  %v3352_v47 = vld [vmem:[#allocation7 + $0x2d0] ss:$8 sps:$4 sm:$0xff]  }
 0x111   :  { %944 = vmatpush1.bf16.msra.mxu0 %v3278_v48  ;;  %v3357_v48 = vld [vmem:[#allocation7 + $0x2e4] ss:$8 sps:$4 sm:$0xff]  }
 0x112   :  { %945 = vmatprep.subr.bf16.mxu0 %v3283_v49  ;;  %v3355_v49 = vld [vmem:[#allocation7 + $0x2e0] ss:$8 sps:$4 sm:$0xff]  }
 0x115   :  { %946 = vmatpush1.bf16.msra.mxu0 %v3281_v50  ;;  %v3360_v50 = vld [vmem:[#allocation7 + $0x2f4] ss:$8 sps:$4 sm:$0xff]  }
 0x116   :  { %947 = vmatprep.subr.bf16.mxu0 %v3286_v51  ;;  %v3358_v51 = vld [vmem:[#allocation7 + $0x2f0] ss:$8 sps:$4 sm:$0xff]  }
 0x119   :  { %948 = vmatpush1.bf16.msra.mxu0 %v3284_v52  ;;  %v3365_v52 = vld [vmem:[#allocation7 + $0x304] ss:$8 sps:$4 sm:$0xff]  }
 0x11a   :  { %949 = vmatprep.subr.bf16.mxu0 %v3289_v53  ;;  %v2752_v53 = vcombine.low %v4203_v18, %v4203_v18 }
 0x11d   :  { %950 = vmatpush1.bf16.msra.mxu0 %v3287_v54  ;;  %v3363_v54 = vld [vmem:[#allocation7 + $0x300] ss:$8 sps:$4 sm:$0xff]  }
 0x11e   :  { %951 = vmatprep.subr.bf16.mxu0 %v3292_v55  ;;  %v3368_v55 = vld [vmem:[#allocation7 + $0x314] ss:$8 sps:$4 sm:$0xff]  }
 0x121   :  { %952 = vmatpush1.bf16.msra.mxu0 %v3290_v59  ;;  %v3369_v59 = vld [vmem:[#allocation7 + $0x320] ss:$8 sps:$4 sm:$0xff]  }
 0x122   :  { %953 = vmatprep.subr.bf16.mxu0 %v3295_v60  ;;  %v3374_v60 = vld [vmem:[#allocation7 + $0x334] ss:$8 sps:$4 sm:$0xff]  }
 0x125   :  { %954 = vmatpush1.bf16.msra.mxu0 %v3293_v61  ;;  %v3372_v61 = vld [vmem:[#allocation7 + $0x330] ss:$8 sps:$4 sm:$0xff]  }
 0x126   :  { %955 = vmatprep.subr.bf16.mxu0 %v3298_v63  ;;  %v3375_v63 = vld [vmem:[#allocation7 + $0x340] ss:$8 sps:$4 sm:$0xff]  }
 0x129   :  { %956 = vmatpush1.bf16.msra.mxu0 %v3296_v3  ;;  %v3381_v3 = vld [vmem:[#allocation7 + $0x360] ss:$8 sps:$4 sm:$0xff]  }
 0x12a   :  { %957 = vmatprep.subr.bf16.mxu0 %v3301_v4  ;;  %v3386_v4 = vld [vmem:[#allocation7 + $0x374] ss:$8 sps:$4 sm:$0xff]  }
 0x12d   :  { %958 = vmatpush1.bf16.msra.mxu0 %v3299_v7  ;;  %v3400_v7 = vld [vmem:[#allocation8 + $0x70] sm:$0xff]  }
 0x12e   :  { %959 = vmatprep.subr.bf16.mxu0 %v3304_v8  ;;  %v3401_v8 = vld [vmem:[#allocation8 + $0x30] sm:$0xff]   ;;  %3058 = vmatprep.subr.bf16.mxu1 %v3400_v7 }
 0x12f   :  { %3059 = vmatpush3.bf16.msra.mxu1 %v3401_v8 }
 0x130   :  { %3060 = vmatprep.subr.bf16.mxu1 %v3402_v9 }
 0x131   :  { %960 = vmatpush1.bf16.msra.mxu0 %v3302_v11  ;;  %v3960_v11 = vmov 0.0  }
 0x132   :  { %961 = vmatprep.subr.bf16.mxu0 %v3307_v12  ;;  %v297_v12 = vlaneseq }
 0x133   :  { %3061 = vmatpush3.bf16.msra.mxu1 %v3403_v10 }
 0x134   :  { %3117 = vmatprep.subr.bf16.mxu1 %v3960_v11  ;;  %v4213_v13 = vshrl.u32 %v297_v12, 7 }
 0x135   :  { %962 = vmatpush1.bf16.msra.mxu0 %v3305_v14 }
 0x136   :  { %963 = vmatprep.subr.bf16.mxu0 %v3310_v15  ;;  %v4216_v14 = vsub.s32 0, %v4213_v13  ;;  %v295_v15 = vld [vmem:[%s4373_s27] sm:$0x3] }
 0x139   :  { %964 = vmatpush1.bf16.msra.mxu0 %v3308_v16  ;;  %v4222_v16 = vsub.s32 1, %v4213_v13 }
 0x13a   :  { %974 = vmatprep.subr.bf16.mxu0 %v3315_v17  ;;  %v300_v17 = vrot.slane %v295_v15, %v4216_v14 }
 0x13b   :  { %v304_v18 = vrot.slane %v295_v15, %v4222_v16 }
 0x13c   :  { %966 = vmatmul.mubr.bf16.vlgmr.msra.gmra.mrb[0].mxu0 %v2750_v20 }
 0x13d   :  { %975 = vmatpush1.bf16.msra.mxu0 %v3313_v19  ;;  %1006 = vmatprep.mubr.bf16.mxu0 %v2753_v22 }
 0x13e   :  { %976 = vmatprep.subr.bf16.mxu0 %v3318_v21 }
 0x141   :  { %977 = vmatpush1.bf16.msra.mxu0 %v3316_v23 }
 0x142   :  { %978 = vmatprep.subr.bf16.mxu0 %v3321_v24 }
 0x145   :  { %979 = vmatpush1.bf16.msra.mxu0 %v3319_v25 }
 0x146   :  { %980 = vmatprep.subr.bf16.mxu0 %v3324_v26 }
 0x149   :  { %981 = vmatpush1.bf16.msra.mxu0 %v3322_v27 }
 0x14a   :  { %982 = vmatprep.subr.bf16.mxu0 %v3327_v28  ;;  %v3404_v28 = vld [vmem:[#allocation10] sm:$0xff]  }
 0x14d   :  { %983 = vmatpush1.bf16.msra.mxu0 %v3325_v29 }
 0x14e   :  { %984 = vmatprep.subr.bf16.mxu0 %v3330_v30  ;;  %v3405_v30 = vld [vmem:[#allocation10 + $0x8] sm:$0xff]  }
 0x151   :  { %985 = vmatpush1.bf16.msra.mxu0 %v3328_v31  ;;  %v3406_v31 = vld [vmem:[#allocation10 + $0x10] sm:$0xff]  }
 0x152   :  { %986 = vmatprep.subr.bf16.mxu0 %v3333_v32  ;;  %v3407_v32 = vld [vmem:[#allocation10 + $0x18] sm:$0xff]  }
 0x155   :  { %987 = vmatpush1.bf16.msra.mxu0 %v3331_v33  ;;  %v3408_v33 = vld [vmem:[#allocation10 + $0x20] sm:$0xff]  }
 0x156   :  { %988 = vmatprep.subr.bf16.mxu0 %v3336_v34  ;;  %v3409_v34 = vld [vmem:[#allocation10 + $0x28] sm:$0xff]  }
 0x159   :  { %989 = vmatpush1.bf16.msra.mxu0 %v3334_v35  ;;  %v3410_v35 = vld [vmem:[#allocation10 + $0x30] sm:$0xff]  }
 0x15a   :  { %990 = vmatprep.subr.bf16.mxu0 %v3339_v36  ;;  %v3411_v36 = vld [vmem:[#allocation10 + $0x38] sm:$0xff]  }
 0x15d   :  { %991 = vmatpush1.bf16.msra.mxu0 %v3337_v37 }
 0x15e   :  { %992 = vmatprep.subr.bf16.mxu0 %v3342_v38  ;;  %v2867_v38 = vld [vmem:[%s4342_s5] ss:$0 sm:$0xff] }
 0x161   :  { %993 = vmatpush1.bf16.msra.mxu0 %v3340_v39 }
 0x162   :  { %994 = vmatprep.subr.bf16.mxu0 %v3345_v40 }
 0x165   :  { %995 = vmatpush1.bf16.msra.mxu0 %v3343_v41 }
 0x166   :  { %996 = vmatprep.subr.bf16.mxu0 %v3348_v42 }
 0x169   :  { %997 = vmatpush1.bf16.msra.mxu0 %v3346_v43 }
 0x16a   :  { %998 = vmatprep.subr.bf16.mxu0 %v3351_v44 }
 0x16d   :  { %999 = vmatpush1.bf16.msra.mxu0 %v3349_v45  ;;  %v3412_v45 = vld [vmem:[#allocation11] sm:$0xff]  }
 0x16e   :  { %1000 = vmatprep.subr.bf16.mxu0 %v3354_v46 }
 0x171   :  { %1001 = vmatpush1.bf16.msra.mxu0 %v3352_v47  ;;  %v3413_v47 = vld [vmem:[#allocation11 + $0x8] sm:$0xff]  }
 0x172   :  { %1002 = vmatprep.subr.bf16.mxu0 %v3357_v48  ;;  %v3414_v48 = vld [vmem:[#allocation11 + $0x10] sm:$0xff]  }
 0x175   :  { %1003 = vmatpush1.bf16.msra.mxu0 %v3355_v49  ;;  %v3415_v49 = vld [vmem:[#allocation11 + $0x18] sm:$0xff]  }
 0x176   :  { %1004 = vmatprep.subr.bf16.mxu0 %v3360_v50  ;;  %v3416_v50 = vld [vmem:[#allocation11 + $0x20] sm:$0xff]  }
 0x179   :  { %1005 = vmatpush1.bf16.msra.mxu0 %v3358_v51  ;;  %v3417_v51 = vld [vmem:[#allocation11 + $0x28] sm:$0xff]  }
 0x17a   :  { %1015 = vmatprep.subr.bf16.mxu0 %v3365_v52  ;;  %v3418_v52 = vld [vmem:[#allocation11 + $0x30] sm:$0xff]  }
 0x17c   :  { %1007 = vmatmul.mubr.bf16.vlgmr.msra.gmra.mrb[0].mxu0 %v2752_v53  ;;  %v3419_v53 = vld [vmem:[#allocation11 + $0x38] sm:$0xff]  }
 0x17d   :  { %1016 = vmatpush1.bf16.msra.mxu0 %v3363_v54  ;;  %1047 = vmatprep.mubr.bf16.mxu0 %v3959_v57  ;;  %v3420_v54 = vld [vmem:[#allocation13] sm:$0xff]  }
 0x17e   :  { %1017 = vmatprep.subr.bf16.mxu0 %v3368_v55  ;;  %v3421_v55 = vld [vmem:[#allocation13 + $0x8] sm:$0xff]  }
 0x181   :  { %1018 = vmatpush1.bf16.msra.mxu0 %v3366_v56  ;;  %v3422_v56 = vld [vmem:[#allocation13 + $0x10] sm:$0xff]  }
 0x182   :  { %1019 = vmatprep.subr.bf16.mxu0 %v3371_v58  ;;  %v3423_v58 = vld [vmem:[#allocation13 + $0x18] sm:$0xff]  }
 0x185   :  { %1020 = vmatpush1.bf16.msra.mxu0 %v3369_v59  ;;  %v3424_v59 = vld [vmem:[#allocation13 + $0x20] sm:$0xff]  }
 0x186   :  { %1021 = vmatprep.subr.bf16.mxu0 %v3374_v60  ;;  %v3425_v60 = vld [vmem:[#allocation13 + $0x28] sm:$0xff]  }
 0x189   :  { %1022 = vmatpush1.bf16.msra.mxu0 %v3372_v61  ;;  %v3426_v61 = vld [vmem:[#allocation13 + $0x30] sm:$0xff]  }
 0x18a   :  { %1023 = vmatprep.subr.bf16.mxu0 %v3377_v62  ;;  %v3427_v62 = vld [vmem:[#allocation13 + $0x38] sm:$0xff]  }
 0x18d   :  { %1024 = vmatpush1.bf16.msra.mxu0 %v3375_v63  ;;  %v3430_v63 = vld [vmem:[#allocation14 + $0x4] ss:$8 sps:$4 sm:$0xff]  }
 0x18e   :  { %1025 = vmatprep.subr.bf16.mxu0 %v3380_v0  ;;  %v2884_v0 = vld [vmem:[%s4344_s7] ss:$0 sm:$0xff] }
 0x191   :  { %1026 = vmatpush1.bf16.msra.mxu0 %v3378_v1 }
 0x192   :  { %1027 = vmatprep.subr.bf16.mxu0 %v3383_v2 }
 0x195   :  { %1028 = vmatpush1.bf16.msra.mxu0 %v3381_v3 }
 0x196   :  { %1029 = vmatprep.subr.bf16.mxu0 %v3386_v4 }
 0x199   :  { %1030 = vmatpush1.bf16.msra.mxu0 %v3384_v5 }
 0x19c   :  { %1048 = vmatmul.mubr.bf16.vlgmr.msra.gmra.mrb[0].mxu0 %v3387_v6  ;;  %v2893_v6 = vld [vmem:[%s4346_s9] ss:$0 sm:$0xff] }
 0x26f   :  { %v1049_v19 = vpop.f32.mrb[0].mxu0 }
 0x270   :  { %v3177_v20 = vadd.f32 %v1049_v19, %v300_v17  ;;  %v1051_v21 = vpop.f32.mrb[1].mxu0  ;;  %v1459_v17 = vld [vmem:[#allocation5] sm:$0xff] }
 0x271   :  { %v3178_v22 = vadd.f32 %v1051_v21, %v304_v18  ;;  %v1053_v23 = vpop.f32.mrb[2].mxu0  ;;  %v3428_v21 = vld [vmem:[#allocation14] ss:$8 sps:$4 sm:$0xff]  }
 0x272   :  { %v1056_v24 = vmax.f32 %v3177_v20, 0.0  ;;  %v1054_v25 = vpop.f32.mrb[3].mxu0  ;;  %v3433_v23 = vld [vmem:[#allocation14 + $0x14] ss:$8 sps:$4 sm:$0xff]  }
 0x273   :  { %v1057_v26 = vmax.f32 %v3178_v22, 0.0  ;;  %v3436_v25 = vld [vmem:[#allocation14 + $0x24] ss:$8 sps:$4 sm:$0xff]  }
 0x274   :  { %v1058_v29 = vpack.c.bf16 %v1056_v24, %v1056_v24  ;;  %v3431_v24 = vld [vmem:[#allocation14 + $0x10] ss:$8 sps:$4 sm:$0xff]  }
 0x275   :  { %v1059_v27 = vpack.c.bf16 %v1057_v26, %v1057_v26  ;;  %v3434_v26 = vld [vmem:[#allocation14 + $0x20] ss:$8 sps:$4 sm:$0xff]  }
 0x277   :  { %1227 = vmatprep.mubr.bf16.mxu1 %v1059_v27  ;;  %v3439_v27 = vld [vmem:[#allocation14 + $0x34] ss:$8 sps:$4 sm:$0xff]  }
 0x278   :  { %1228 = vmatmul.mubr.bf16.vlgmr.msra.gmra.mrb[0].mxu1 %v1058_v29  ;;  %v3442_v29 = vld [vmem:[#allocation14 + $0x44] ss:$8 sps:$4 sm:$0xff]  }
 0x279   :  { %3118 = vmatpush3.bf16.msra.mxu1 %v3404_v28  ;;  %3133 = vmatprep.mubr.msk.bf16.mxu1 %vm3961_vm0, %v3960_v11  ;;  %v3437_v28 = vld [vmem:[#allocation14 + $0x30] ss:$8 sps:$4 sm:$0xff]  }
 0x27a   :  { %3119 = vmatprep.subr.bf16.mxu1 %v3960_v11 }
 0x27d   :  { %3120 = vmatpush3.bf16.msra.mxu1 %v3405_v30  ;;  %v3440_v30 = vld [vmem:[#allocation14 + $0x40] ss:$8 sps:$4 sm:$0xff]  }
 0x27e   :  { %3121 = vmatprep.subr.bf16.mxu1 %v3960_v11 }
 0x281   :  { %3122 = vmatpush3.bf16.msra.mxu1 %v3406_v31  ;;  %v3445_v31 = vld [vmem:[#allocation14 + $0x54] ss:$8 sps:$4 sm:$0xff]  }
 0x282   :  { %3123 = vmatprep.subr.bf16.mxu1 %v3960_v11 }
 0x285   :  { %3124 = vmatpush3.bf16.msra.mxu1 %v3407_v32  ;;  %v3443_v32 = vld [vmem:[#allocation14 + $0x50] ss:$8 sps:$4 sm:$0xff]  }
 0x286   :  { %3125 = vmatprep.subr.bf16.mxu1 %v3960_v11 }
 0x289   :  { %3126 = vmatpush3.bf16.msra.mxu1 %v3408_v33  ;;  %v3448_v33 = vld [vmem:[#allocation14 + $0x64] ss:$8 sps:$4 sm:$0xff]  }
 0x28a   :  { %3127 = vmatprep.subr.bf16.mxu1 %v3960_v11 }
 0x28d   :  { %3128 = vmatpush3.bf16.msra.mxu1 %v3409_v34  ;;  %v3451_v34 = vld [vmem:[#allocation14 + $0x74] ss:$8 sps:$4 sm:$0xff]  }
 0x28e   :  { %3129 = vmatprep.subr.bf16.mxu1 %v3960_v11 }
 0x291   :  { %3130 = vmatpush3.bf16.msra.mxu1 %v3410_v35  ;;  %v3449_v35 = vld [vmem:[#allocation14 + $0x70] ss:$8 sps:$4 sm:$0xff]  }
 0x292   :  { %3131 = vmatprep.subr.bf16.mxu1 %v3960_v11 }
 0x295   :  { %3132 = vmatpush3.bf16.msra.mxu1 %v3411_v36  ;;  %v3454_v36 = vld [vmem:[#allocation16 + $0x4] ss:$28 sps:$4 sm:$0xff]  }
 0x296   :  { %3137 = vmatprep.subr.bf16.mxu1 %v3960_v11 }
 0x34b   :  { %v3062_v37 = vpop.f32.mrb[0].mxu1 }
 0x34c   :  { %v3063_v39 = vpop.f32.mrb[1].mxu1 }
 0x34d   :  { %v3064_v40 = vadd.f32 %v3063_v39, %v3062_v37  ;;  %v3065_v41 = vpop.f32.mrb[2].mxu1  ;;  %v3455_v37 = vld [vmem:[#allocation16 + $0x8] ss:$28 sps:$4 sm:$0xff]  }
 0x34e   :  { %v3066_v42 = vpop.f32.mrb[3].mxu1  ;;  %v3463_v39 = vld [vmem:[#allocation16 + $0x44] ss:$28 sps:$4 sm:$0xff]   ;;  %v3469_v41 = vld [vmem:[#allocation16 + $0x7c] ss:$28 sps:$4 sm:$0xff]  }
 0x34f   :  { %v1230_v43 = vadd.f32 %v3064_v40, %v2867_v38  ;;  %v3457_v38 = vld [vmem:[#allocation16 + $0xc] ss:$28 sps:$4 sm:$0xff]   ;;  %v3461_v40 = vld [vmem:[#allocation16 + $0x40] ss:$28 sps:$4 sm:$0xff]   ;;  %v3467_v42 = vld [vmem:[#allocation16 + $0x78] ss:$28 sps:$4 sm:$0xff]  }
 0x350   :  { %2514 = vmatprep.subr.bf16.mxu0 %v3457_v38  ;;  %v3530_v38 = vld [vmem:[#allocation16 + $0x2d8] ss:$28 sps:$4 sm:$0xff]  }
 0x351   :  { %v1235_v44 = vmax.f32 %v1230_v43, 0.0  ;;  %2515 = vmatpush1.bf16.msra.mxu0 %v3455_v37  ;;  %v3475_v43 = vld [vmem:[#allocation16 + $0xb4] ss:$28 sps:$4 sm:$0xff]   ;;  %v3532_v37 = vld [vmem:[#allocation16 + $0x2dc] ss:$28 sps:$4 sm:$0xff]  }
 0x352   :  { %2516 = vmatprep.subr.bf16.mxu0 %v3463_v39  ;;  %v3538_v39 = vld [vmem:[#allocation16 + $0x314] ss:$28 sps:$4 sm:$0xff]  }
 0x353   :  { %v1236_v46 = vpack.c.bf16 %v1235_v44, %v1235_v44  ;;  %v3473_v44 = vld [vmem:[#allocation16 + $0xb0] ss:$28 sps:$4 sm:$0xff]  }
 0x355   :  { %3134 = vmatmul.mubr.bf16.vlgmr.msra.gmra.mrb[4].mxu1 %v1236_v46  ;;  %2517 = vmatpush1.bf16.msra.mxu0 %v3461_v40  ;;  %v3541_v40 = vld [vmem:[#allocation16 + $0x31c] ss:$28 sps:$4 sm:$0xff]  }
 0x356   :  { %3138 = vmatpush3.bf16.msra.mxu1 %v3412_v45  ;;  %3153 = vmatprep.mubr.msk.bf16.mxu1 %vm3961_vm0, %v3960_v11  ;;  %v3481_v45 = vld [vmem:[#allocation16 + $0xec] ss:$28 sps:$4 sm:$0xff]  }
 0x357   :  { %3139 = vmatprep.subr.bf16.mxu1 %v3960_v11  ;;  %2518 = vmatprep.subr.bf16.mxu0 %v3469_v41  ;;  %v3536_v41 = vld [vmem:[#allocation16 + $0x310] ss:$28 sps:$4 sm:$0xff]  }
 0x359   :  { %2519 = vmatpush1.bf16.msra.mxu0 %v3467_v42  ;;  %v3539_v42 = vld [vmem:[#allocation16 + $0x318] ss:$28 sps:$4 sm:$0xff]  }
 0x35a   :  { %3140 = vmatpush3.bf16.msra.mxu1 %v3413_v47  ;;  %2520 = vmatprep.subr.bf16.mxu0 %v3475_v43  ;;  %v3487_v47 = vld [vmem:[#allocation16 + $0x124] ss:$28 sps:$4 sm:$0xff]   ;;  %v3544_v43 = vld [vmem:[#allocation16 + $0x34c] ss:$28 sps:$4 sm:$0xff]  }
 0x35b   :  { %3141 = vmatprep.subr.bf16.mxu1 %v3960_v11 }
 0x35d   :  { %2521 = vmatpush1.bf16.msra.mxu0 %v3473_v44  ;;  %v3547_v44 = vld [vmem:[#allocation16 + $0x354] ss:$28 sps:$4 sm:$0xff]  }
 0x35e   :  { %3142 = vmatpush3.bf16.msra.mxu1 %v3414_v48  ;;  %2522 = vmatprep.subr.bf16.mxu0 %v3481_v45  ;;  %v3485_v48 = vld [vmem:[#allocation16 + $0x120] ss:$28 sps:$4 sm:$0xff]   ;;  %v3542_v45 = vld [vmem:[#allocation16 + $0x348] ss:$28 sps:$4 sm:$0xff]  }
 0x35f   :  { %3143 = vmatprep.subr.bf16.mxu1 %v3960_v11 }
 0x362   :  { %3144 = vmatpush3.bf16.msra.mxu1 %v3415_v49  ;;  %v3493_v49 = vld [vmem:[#allocation16 + $0x15c] ss:$28 sps:$4 sm:$0xff]  }
 0x363   :  { %3145 = vmatprep.subr.bf16.mxu1 %v3960_v11 }
 0x366   :  { %3146 = vmatpush3.bf16.msra.mxu1 %v3416_v50  ;;  %v3491_v50 = vld [vmem:[#allocation16 + $0x158] ss:$28 sps:$4 sm:$0xff]  }
 0x367   :  { %3147 = vmatprep.subr.bf16.mxu1 %v3960_v11 }
 0x36a   :  { %3148 = vmatpush3.bf16.msra.mxu1 %v3417_v51  ;;  %v3499_v51 = vld [vmem:[#allocation16 + $0x194] ss:$28 sps:$4 sm:$0xff]  }
 0x36b   :  { %3149 = vmatprep.subr.bf16.mxu1 %v3960_v11 }
 0x36e   :  { %3150 = vmatpush3.bf16.msra.mxu1 %v3418_v52  ;;  %v3497_v52 = vld [vmem:[#allocation16 + $0x190] ss:$28 sps:$4 sm:$0xff]  }
 0x36f   :  { %3151 = vmatprep.subr.bf16.mxu1 %v3960_v11 }
 0x372   :  { %3152 = vmatpush3.bf16.msra.mxu1 %v3419_v53  ;;  %v3505_v53 = vld [vmem:[#allocation16 + $0x1cc] ss:$28 sps:$4 sm:$0xff]  }
 0x373   :  { %3157 = vmatprep.subr.bf16.mxu1 %v3960_v11 }
 0x375   :  { %3154 = vmatmul.mubr.bf16.vlgmr.msra.gmra.mrb[8].mxu1 %v1236_v46  ;;  %v3479_v46 = vld [vmem:[#allocation16 + $0xe8] ss:$28 sps:$4 sm:$0xff]  }
 0x376   :  { %3173 = vmatprep.mubr.msk.bf16.mxu1 %vm3961_vm0, %v3960_v11  ;;  %3158 = vmatpush3.bf16.msra.mxu1 %v3420_v54  ;;  %v3503_v54 = vld [vmem:[#allocation16 + $0x1c8] ss:$28 sps:$4 sm:$0xff]  }
 0x377   :  { %3159 = vmatprep.subr.bf16.mxu1 %v3960_v11  ;;  %2523 = vmatpush1.bf16.msra.mxu0 %v3479_v46  ;;  %v3545_v46 = vld [vmem:[#allocation16 + $0x350] ss:$28 sps:$4 sm:$0xff]  }
 0x378   :  { %2524 = vmatprep.subr.bf16.mxu0 %v3487_v47  ;;  %v3550_v47 = vld [vmem:[#allocation16 + $0x14] ss:$28 sps:$4 sm:$0xff]  }
 0x37a   :  { %3160 = vmatpush3.bf16.msra.mxu1 %v3421_v55  ;;  %v3511_v55 = vld [vmem:[#allocation16 + $0x204] ss:$28 sps:$4 sm:$0xff]  }
 0x37b   :  { %3161 = vmatprep.subr.bf16.mxu1 %v3960_v11  ;;  %2525 = vmatpush1.bf16.msra.mxu0 %v3485_v48  ;;  %v3551_v48 = vld [vmem:[#allocation16 + $0x1d8] ss:$28 sps:$4 sm:$0xff]  }
 0x37c   :  { %2526 = vmatprep.subr.bf16.mxu0 %v3493_v49  ;;  %v1595_v49 = vld [vmem:[%s4350_s13] sm:$0x3]  ;;  %s3962_s13 = smov [#allocation18]  }
 0x37d   :  { %s2704_s25 = sshll.u32 %s3962_s13, 4  ;;  %s2705_s25 = int_to_ptr.vmem [resolvable:$true] %s2704_s25 }
 0x37e   :  { %3162 = vmatpush3.bf16.msra.mxu1 %v3422_v56  ;;  %v3509_v56 = vld [vmem:[#allocation16 + $0x200] ss:$28 sps:$4 sm:$0xff]   ;;  %s3840_s26 = scalar_lea.vmem %s2705_s25, 128  ;;  %p3845_p3 = scmp.lt.s32.totalorder %s2705_s25, %s2705_s25 }
 0x37f   :  { %3163 = vmatprep.subr.bf16.mxu1 %v3960_v11  ;;  %2527 = vmatpush1.bf16.msra.mxu0 %v3491_v50  ;;  %v1600_v50 = vrot.slane %v1595_v49, %v4216_v14  ;;  %p3841_p2 = scmp.ne.s32.totalorder %s2705_s25, %s3840_s26  ;;  %p3846_p4 = scmp.lt.s32.totalorder %s3840_s26, %s3840_s26 }
 0x380   :  { %2528 = vmatprep.subr.bf16.mxu0 %v3499_v51  ;;  %v1604_v51 = vrot.slane %v1595_v49, %v4222_v16 }
 0x381   :  { %p3847_p5 = por %p3846_p4, %p3845_p3 }
 0x382   :  { %3164 = vmatpush3.bf16.msra.mxu1 %v3423_v58  ;;  %v3517_v58 = vld [vmem:[#allocation16 + $0x23c] ss:$28 sps:$4 sm:$0xff]  }
 0x383   :  { %3165 = vmatprep.subr.bf16.mxu1 %v3960_v11  ;;  %2529 = vmatpush1.bf16.msra.mxu0 %v3497_v52  ;;  %p3848_p6 = pnand %p3847_p5, %p3841_p2 }
 0x384   :  { %2530 = vmatprep.subr.bf16.mxu0 %v3505_v53 }
 0x386   :  { %3166 = vmatpush3.bf16.msra.mxu1 %v3424_v59  ;;  %v3515_v59 = vld [vmem:[#allocation16 + $0x238] ss:$28 sps:$4 sm:$0xff]  }
 0x387   :  { %3167 = vmatprep.subr.bf16.mxu1 %v3960_v11  ;;  %2531 = vmatpush1.bf16.msra.mxu0 %v3503_v54 }
 0x388   :  { %2532 = vmatprep.subr.bf16.mxu0 %v3511_v55 }
 0x38a   :  { %3168 = vmatpush3.bf16.msra.mxu1 %v3425_v60  ;;  %v3523_v60 = vld [vmem:[#allocation16 + $0x274] ss:$28 sps:$4 sm:$0xff]  }
 0x38b   :  { %3169 = vmatprep.subr.bf16.mxu1 %v3960_v11  ;;  %2533 = vmatpush1.bf16.msra.mxu0 %v3509_v56 }
 0x38c   :  { %2534 = vmatprep.subr.bf16.mxu0 %v3517_v58 }
 0x38e   :  { %3170 = vmatpush3.bf16.msra.mxu1 %v3426_v61  ;;  %v3521_v61 = vld [vmem:[#allocation16 + $0x270] ss:$28 sps:$4 sm:$0xff]  }
 0x38f   :  { %3171 = vmatprep.subr.bf16.mxu1 %v3960_v11  ;;  %2535 = vmatpush1.bf16.msra.mxu0 %v3515_v59 }
 0x390   :  { %2536 = vmatprep.subr.bf16.mxu0 %v3523_v60 }
 0x392   :  { %3172 = vmatpush3.bf16.msra.mxu1 %v3427_v62  ;;  %v3529_v62 = vld [vmem:[#allocation16 + $0x2ac] ss:$28 sps:$4 sm:$0xff]  }
 0x393   :  { %1687 = vmatprep.subr.bf16.mxu1 %v3430_v63  ;;  %2537 = vmatpush1.bf16.msra.mxu0 %v3521_v61  ;;  %v3527_v63 = vld [vmem:[#allocation16 + $0x2a8] ss:$28 sps:$4 sm:$0xff]  }
 0x394   :  { %2538 = vmatprep.subr.bf16.mxu0 %v3529_v62  ;;  %v3548_v62 = vld [vmem:[#allocation16 + $0x10] ss:$28 sps:$4 sm:$0xff]  }
 0x397   :  { %2539 = vmatpush1.bf16.msra.mxu0 %v3527_v63  ;;  %v3552_v63 = vld [vmem:[#allocation16 + $0x18] ss:$28 sps:$4 sm:$0xff]  }
 0x428   :  { %v1342_v1 = vpop.f32.mrb[4].mxu1 }
 0x429   :  { %v1343_v2 = vadd.f32 %v2884_v0, %v1342_v1  ;;  %v3135_v3 = vpop.f32.mrb[5].mxu1  ;;  %v3535_v0 = vld [vmem:[#allocation16 + $0x2e4] ss:$28 sps:$4 sm:$0xff]  }
 0x42a   :  { %v1345_v4 = vpop.f32.mrb[6].mxu1  ;;  %v3533_v1 = vld [vmem:[#allocation16 + $0x2e0] ss:$28 sps:$4 sm:$0xff]   ;;  %2540 = vmatprep.subr.bf16.mxu0 %v3535_v0 }
 0x42b   :  { %2685 = vst [vmem:[#allocation18] sm:$0xff] %v1343_v2  ;;  %v3136_v5 = vpop.f32.mrb[7].mxu1  ;;  %2541 = vmatpush1.bf16.msra.mxu0 %v3533_v1  ;;  %v3555_v1 = vld [vmem:[#allocation16 + $0x4c] ss:$28 sps:$4 sm:$0xff]  }
 0x42c   :  { %2542 = vmatprep.subr.bf16.mxu0 %v3541_v40  ;;  %v3600_v40 = vld [vmem:[#allocation16 + $0x2b0] ss:$28 sps:$4 sm:$0xff]  }
 0x42f   :  { %2543 = vmatpush1.bf16.msra.mxu0 %v3539_v42  ;;  %v3603_v42 = vld [vmem:[#allocation16 + $0x2e8] ss:$28 sps:$4 sm:$0xff]  }
 0x430   :  { %2544 = vmatprep.subr.bf16.mxu0 %v3547_v44  ;;  %v3606_v44 = vld [vmem:[#allocation16 + $0x320] ss:$28 sps:$4 sm:$0xff]  }
 0x433   :  { %2545 = vmatpush1.bf16.msra.mxu0 %v3545_v46  ;;  %v3609_v46 = vld [vmem:[#allocation16 + $0x358] ss:$28 sps:$4 sm:$0xff]  }
 0x434   :  { %3095 = vmatprep.subr.bf16.mxu0 %v3551_v48 }
 0x448   :  { %v1453_v7 = vpop.f32.mrb[8].mxu1 }
 0x449   :  { %v1454_v8 = vadd.f32 %v2893_v6, %v1453_v7  ;;  %v3155_v9 = vpop.f32.mrb[9].mxu1 }
 0x44a   :  { %v1456_v10 = vpop.f32.mrb[10].mxu1  ;;  %v3452_v9 = vld [vmem:[#allocation16] ss:$28 sps:$4 sm:$0xff]  }
 0x44b   :  { %v1460_v11 = vmul.f32 0.5, %v1454_v8  ;;  %2686 = vst [vmem:[#allocation20] sm:$0xff] %v1454_v8  ;;  %v3156_v12 = vpop.f32.mrb[11].mxu1 }
 0x44c   :  { %v3458_v12 = vld [vmem:[#allocation16 + $0x38] ss:$28 sps:$4 sm:$0xff]  }
 0x44d   :  { %v1461_v15 = vmul.f32 1.442695, %v1460_v11  ;;  %v3460_v11 = vld [vmem:[#allocation16 + $0x3c] ss:$28 sps:$4 sm:$0xff]  }
 0x44f   :  { %3612 = vpow2.f32 %v1461_v15  ;;  %v3466_v15 = vld [vmem:[#allocation16 + $0x74] ss:$28 sps:$4 sm:$0xff]  }
 0x459   :  { %v3613_v18 = vpop.eup %3612 }
 0x45a   :  { %v1463_v19 = vmul.f32 %v3613_v18, %v1459_v17  ;;  %v3464_v17 = vld [vmem:[#allocation16 + $0x70] ss:$28 sps:$4 sm:$0xff]  }
 0x45b   :  { %v3472_v18 = vld [vmem:[#allocation16 + $0xac] ss:$28 sps:$4 sm:$0xff]  }
 0x45c   :  { %v1464_v20 = vadd.f32 %v1463_v19, %v1343_v2  ;;  %v2902_v2 = vld [vmem:[%s4348_s11] ss:$0 sm:$0xff]  ;;  %v3470_v19 = vld [vmem:[#allocation16 + $0xa8] ss:$28 sps:$4 sm:$0xff]  }
 0x45e   :  { %v1465_v22 = vpack.c.bf16 %v1464_v20, %v1464_v20  ;;  %2687 = vst [vmem:[#allocation21] sm:$0xff] %v1464_v20  ;;  %v3478_v20 = vld [vmem:[#allocation16 + $0xe4] ss:$28 sps:$4 sm:$0xff]  }
 0x460   :  { %3174 = vmatmul.mubr.bf16.vlgmr.msra.gmra.mrb[12].mxu1 %v1465_v22  ;;  %v3484_v22 = vld [vmem:[#allocation16 + $0x11c] ss:$28 sps:$4 sm:$0xff]  }
 0x461   :  { %1688 = vmatpush1.bf16.msra.mxu1 %v3428_v21  ;;  %1719 = vmatprep.mubr.bf16.mxu1 %v3959_v57  ;;  %v3446_v57 = vld [vmem:[#allocation14 + $0x60] ss:$8 sps:$4 sm:$0xff]  }
 0x462   :  { %1689 = vmatprep.subr.bf16.mxu1 %v3433_v23  ;;  %v3476_v21 = vld [vmem:[#allocation16 + $0xe0] ss:$28 sps:$4 sm:$0xff]   ;;  %v3482_v23 = vld [vmem:[#allocation16 + $0x118] ss:$28 sps:$4 sm:$0xff]  }
 0x465   :  { %1690 = vmatpush1.bf16.msra.mxu1 %v3431_v24  ;;  %v3490_v24 = vld [vmem:[#allocation16 + $0x154] ss:$28 sps:$4 sm:$0xff]  }
 0x466   :  { %1691 = vmatprep.subr.bf16.mxu1 %v3436_v25  ;;  %v3488_v25 = vld [vmem:[#allocation16 + $0x150] ss:$28 sps:$4 sm:$0xff]  }
 0x469   :  { %1692 = vmatpush1.bf16.msra.mxu1 %v3434_v26  ;;  %v3496_v26 = vld [vmem:[#allocation16 + $0x18c] ss:$28 sps:$4 sm:$0xff]  }
 0x46a   :  { %1693 = vmatprep.subr.bf16.mxu1 %v3439_v27  ;;  %v3494_v27 = vld [vmem:[#allocation16 + $0x188] ss:$28 sps:$4 sm:$0xff]  }
 0x46d   :  { %1694 = vmatpush1.bf16.msra.mxu1 %v3437_v28  ;;  %v3502_v28 = vld [vmem:[#allocation16 + $0x1c4] ss:$28 sps:$4 sm:$0xff]  }
 0x46e   :  { %1695 = vmatprep.subr.bf16.mxu1 %v3442_v29  ;;  %v3500_v29 = vld [vmem:[#allocation16 + $0x1c0] ss:$28 sps:$4 sm:$0xff]  }
 0x471   :  { %1696 = vmatpush1.bf16.msra.mxu1 %v3440_v30  ;;  %v3508_v30 = vld [vmem:[#allocation16 + $0x1fc] ss:$28 sps:$4 sm:$0xff]  }
 0x472   :  { %1697 = vmatprep.subr.bf16.mxu1 %v3445_v31  ;;  %v3506_v31 = vld [vmem:[#allocation16 + $0x1f8] ss:$28 sps:$4 sm:$0xff]  }
 0x475   :  { %1698 = vmatpush1.bf16.msra.mxu1 %v3443_v32  ;;  %v3514_v32 = vld [vmem:[#allocation16 + $0x234] ss:$28 sps:$4 sm:$0xff]  }
 0x476   :  { %1699 = vmatprep.subr.bf16.mxu1 %v3448_v33  ;;  %v3512_v33 = vld [vmem:[#allocation16 + $0x230] ss:$28 sps:$4 sm:$0xff]  }
 0x479   :  { %1700 = vmatpush1.bf16.msra.mxu1 %v3446_v57  ;;  %v3520_v57 = vld [vmem:[#allocation16 + $0x26c] ss:$28 sps:$4 sm:$0xff]  }
 0x47a   :  { %1701 = vmatprep.subr.bf16.mxu1 %v3451_v34  ;;  %v3518_v34 = vld [vmem:[#allocation16 + $0x268] ss:$28 sps:$4 sm:$0xff]  }
 0x47d   :  { %1702 = vmatpush1.bf16.msra.mxu1 %v3449_v35  ;;  %v3526_v35 = vld [vmem:[#allocation16 + $0x2a4] ss:$28 sps:$4 sm:$0xff]  }
 0x47e   :  { %2473 = vmatprep.subr.bf16.mxu1 %v3454_v36  ;;  %v3524_v36 = vld [vmem:[#allocation16 + $0x2a0] ss:$28 sps:$4 sm:$0xff]  }
 0x533   :  { %v1571_v3 = vpop.f32.mrb[12].mxu1 }
 0x534   :  { %v1572_v4 = vadd.f32 %v2902_v2, %v1571_v3  ;;  %v3175_v5 = vpop.f32.mrb[13].mxu1  ;;  %v3556_v2 = vld [vmem:[#allocation16 + $0x210] ss:$28 sps:$4 sm:$0xff]   ;;  %v3553_v3 = vld [vmem:[#allocation16 + $0x48] ss:$28 sps:$4 sm:$0xff]  }
 0x535   :  { %v1574_v6 = vpop.f32.mrb[14].mxu1  ;;  %v3560_v5 = vld [vmem:[#allocation16 + $0x84] ss:$28 sps:$4 sm:$0xff]  }
 0x536   :  { %v1577_v7 = vmax.f32 %v1572_v4, 0.0  ;;  %v3176_v8 = vpop.f32.mrb[15].mxu1  ;;  %v3557_v4 = vld [vmem:[#allocation16 + $0x50] ss:$28 sps:$4 sm:$0xff]   ;;  %v3561_v6 = vld [vmem:[#allocation16 + $0x248] ss:$28 sps:$4 sm:$0xff]  }
 0x537   :  { %v3562_v8 = vld [vmem:[#allocation16 + $0x88] ss:$28 sps:$4 sm:$0xff]  }
 0x538   :  { %v1578_v10 = vpack.c.bf16 %v1577_v7, %v1577_v7  ;;  %v3558_v7 = vld [vmem:[#allocation16 + $0x80] ss:$28 sps:$4 sm:$0xff]  }
 0x53a   :  { %1720 = vmatmul.mubr.bf16.vlgmr.msra.gmra.mrb[16].mxu1 %v1578_v10  ;;  %v3566_v10 = vld [vmem:[#allocation16 + $0x280] ss:$28 sps:$4 sm:$0xff]  }
 0x53b   :  { %2474 = vmatpush1.bf16.msra.mxu1 %v3452_v9  ;;  %v3565_v9 = vld [vmem:[#allocation16 + $0xbc] ss:$28 sps:$4 sm:$0xff]  }
 0x53c   :  { %2475 = vmatprep.subr.bf16.mxu1 %v3460_v11  ;;  %v3563_v11 = vld [vmem:[#allocation16 + $0xb8] ss:$28 sps:$4 sm:$0xff]  }
 0x53f   :  { %2476 = vmatpush1.bf16.msra.mxu1 %v3458_v12  ;;  %v3567_v12 = vld [vmem:[#allocation16 + $0xc0] ss:$28 sps:$4 sm:$0xff]  }
 0x540   :  { %2477 = vmatprep.subr.bf16.mxu1 %v3466_v15  ;;  %v3570_v15 = vld [vmem:[#allocation16 + $0xf4] ss:$28 sps:$4 sm:$0xff]  }
 0x543   :  { %2478 = vmatpush1.bf16.msra.mxu1 %v3464_v17  ;;  %v3571_v17 = vld [vmem:[#allocation16 + $0x2b8] ss:$28 sps:$4 sm:$0xff]  }
 0x544   :  { %2479 = vmatprep.subr.bf16.mxu1 %v3472_v18  ;;  %v3568_v18 = vld [vmem:[#allocation16 + $0xf0] ss:$28 sps:$4 sm:$0xff]  }
 0x547   :  { %2480 = vmatpush1.bf16.msra.mxu1 %v3470_v19  ;;  %v3572_v19 = vld [vmem:[#allocation16 + $0xf8] ss:$28 sps:$4 sm:$0xff]  }
 0x548   :  { %2481 = vmatprep.subr.bf16.mxu1 %v3478_v20  ;;  %v3575_v20 = vld [vmem:[#allocation16 + $0x12c] ss:$28 sps:$4 sm:$0xff]  }
 0x54b   :  { %2482 = vmatpush1.bf16.msra.mxu1 %v3476_v21  ;;  %v3576_v21 = vld [vmem:[#allocation16 + $0x2f0] ss:$28 sps:$4 sm:$0xff]  }
 0x54c   :  { %2483 = vmatprep.subr.bf16.mxu1 %v3484_v22  ;;  %v3573_v22 = vld [vmem:[#allocation16 + $0x128] ss:$28 sps:$4 sm:$0xff]  }
 0x54f   :  { %2484 = vmatpush1.bf16.msra.mxu1 %v3482_v23  ;;  %v3577_v23 = vld [vmem:[#allocation16 + $0x130] ss:$28 sps:$4 sm:$0xff]  }
 0x550   :  { %2485 = vmatprep.subr.bf16.mxu1 %v3490_v24  ;;  %v3580_v24 = vld [vmem:[#allocation16 + $0x164] ss:$28 sps:$4 sm:$0xff]  }
 0x553   :  { %2486 = vmatpush1.bf16.msra.mxu1 %v3488_v25  ;;  %v3581_v25 = vld [vmem:[#allocation16 + $0x328] ss:$28 sps:$4 sm:$0xff]  }
 0x554   :  { %2487 = vmatprep.subr.bf16.mxu1 %v3496_v26  ;;  %v3578_v26 = vld [vmem:[#allocation16 + $0x160] ss:$28 sps:$4 sm:$0xff]  }
 0x557   :  { %2488 = vmatpush1.bf16.msra.mxu1 %v3494_v27  ;;  %v3582_v27 = vld [vmem:[#allocation16 + $0x168] ss:$28 sps:$4 sm:$0xff]  }
 0x558   :  { %2489 = vmatprep.subr.bf16.mxu1 %v3502_v28  ;;  %v3585_v28 = vld [vmem:[#allocation16 + $0x19c] ss:$28 sps:$4 sm:$0xff]  }
 0x55b   :  { %2490 = vmatpush1.bf16.msra.mxu1 %v3500_v29  ;;  %v3586_v29 = vld [vmem:[#allocation16 + $0x360] ss:$28 sps:$4 sm:$0xff]  }
 0x55c   :  { %2491 = vmatprep.subr.bf16.mxu1 %v3508_v30  ;;  %v3583_v30 = vld [vmem:[#allocation16 + $0x198] ss:$28 sps:$4 sm:$0xff]  }
 0x55f   :  { %2492 = vmatpush1.bf16.msra.mxu1 %v3506_v31  ;;  %v3587_v31 = vld [vmem:[#allocation16 + $0x1a0] ss:$28 sps:$4 sm:$0xff]  }
 0x560   :  { %2493 = vmatprep.subr.bf16.mxu1 %v3514_v32  ;;  %v3590_v32 = vld [vmem:[#allocation16 + $0x1d4] ss:$28 sps:$4 sm:$0xff]  }
 0x563   :  { %2494 = vmatpush1.bf16.msra.mxu1 %v3512_v33  ;;  %v3588_v33 = vld [vmem:[#allocation16 + $0x1d0] ss:$28 sps:$4 sm:$0xff]  }
 0x564   :  { %2495 = vmatprep.subr.bf16.mxu1 %v3520_v57  ;;  %v3593_v57 = vld [vmem:[#allocation16 + $0x20c] ss:$28 sps:$4 sm:$0xff]  }
 0x567   :  { %2496 = vmatpush1.bf16.msra.mxu1 %v3518_v34  ;;  %v3591_v34 = vld [vmem:[#allocation16 + $0x208] ss:$28 sps:$4 sm:$0xff]  }
 0x568   :  { %2497 = vmatprep.subr.bf16.mxu1 %v3526_v35  ;;  %v3596_v35 = vld [vmem:[#allocation16 + $0x244] ss:$28 sps:$4 sm:$0xff]  }
 0x56b   :  { %2498 = vmatpush1.bf16.msra.mxu1 %v3524_v36  ;;  %v3594_v36 = vld [vmem:[#allocation16 + $0x240] ss:$28 sps:$4 sm:$0xff]  }
 0x56c   :  { %2499 = vmatprep.subr.bf16.mxu1 %v3532_v37  ;;  %v3599_v37 = vld [vmem:[#allocation16 + $0x27c] ss:$28 sps:$4 sm:$0xff]  }
 0x56f   :  { %2500 = vmatpush1.bf16.msra.mxu1 %v3530_v38  ;;  %v3597_v38 = vld [vmem:[#allocation16 + $0x278] ss:$28 sps:$4 sm:$0xff]  }
 0x570   :  { %2501 = vmatprep.subr.bf16.mxu1 %v3538_v39  ;;  %v3602_v39 = vld [vmem:[#allocation16 + $0x2b4] ss:$28 sps:$4 sm:$0xff]  }
 0x573   :  { %2502 = vmatpush1.bf16.msra.mxu1 %v3536_v41  ;;  %v3605_v41 = vld [vmem:[#allocation16 + $0x2ec] ss:$28 sps:$4 sm:$0xff]  }
 0x574   :  { %2503 = vmatprep.subr.bf16.mxu1 %v3544_v43  ;;  %v3608_v43 = vld [vmem:[#allocation16 + $0x324] ss:$28 sps:$4 sm:$0xff]  }
 0x577   :  { %2504 = vmatpush1.bf16.msra.mxu1 %v3542_v45  ;;  %v3611_v45 = vld [vmem:[#allocation16 + $0x35c] ss:$28 sps:$4 sm:$0xff]  }
 0x578   :  { %2555 = vmatprep.subr.bf16.mxu1 %v3550_v47 }
 0x60d   :  { %v1721_v52 = vpop.f32.mrb[16].mxu1 }
 0x60e   :  { %v1722_v53 = vadd.f32 %v1721_v52, %v1600_v50  ;;  %v1723_v54 = vpop.f32.mrb[17].mxu1 }
 0x60f   :  { %v1724_v55 = vadd.f32 %v1723_v54, %v1604_v51  ;;  %v1725_v56 = vpop.f32.mrb[18].mxu1 }
 0x610   :  { %v1728_v58 = vmax.f32 %v1722_v53, 0.0  ;;  %v1726_v59 = vpop.f32.mrb[19].mxu1 }
 0x611   :  { %v1729_v60 = vmax.f32 %v1724_v55, 0.0 }
 0x612   :  { %v4273_v0 = vpack.c.bf16 %v1728_v58, %v1728_v58 }
 0x613   :  { %v1731_v61 = vpack.c.bf16 %v1729_v60, %v1729_v60 }
 0x615   :  { %2505 = vmatprep.mubr.bf16.mxu1 %v1731_v61  ;;  %2546 = vmatprep.mubr.bf16.mxu0 %v1731_v61 }
 0x616   :  { %2506 = vmatmul.mubr.bf16.vlgmr.msra.gmra.mrb[20].mxu1 %v4273_v0  ;;  %2547 = vmatmul.mubr.bf16.vlgmr.msra.gmra.mrb[4].mxu0 %v4273_v0 }
 0x617   :  { %2556 = vmatpush1.bf16.msra.mxu1 %v3548_v62  ;;  %3096 = vmatpush3.bf16.msra.mxu0 %v3552_v63 }
 0x618   :  { %2587 = vmatprep.mubr.bf16.mxu1 %v1731_v61  ;;  %2628 = vmatprep.mubr.bf16.mxu0 %v1731_v61 }
 0x619   :  { %2557 = vmatprep.subr.bf16.mxu1 %v3555_v1  ;;  %3097 = vmatprep.subr.bf16.mxu0 %v3556_v2 }
 0x61b   :  { %2558 = vmatpush1.bf16.msra.mxu1 %v3553_v3  ;;  %3098 = vmatpush3.bf16.msra.mxu0 %v3557_v4 }
 0x61c   :  { %2559 = vmatprep.subr.bf16.mxu1 %v3560_v5  ;;  %3099 = vmatprep.subr.bf16.mxu0 %v3561_v6 }
 0x61f   :  { %2560 = vmatpush1.bf16.msra.mxu1 %v3558_v7  ;;  %3100 = vmatpush3.bf16.msra.mxu0 %v3562_v8 }
 0x620   :  { %2561 = vmatprep.subr.bf16.mxu1 %v3565_v9  ;;  %3101 = vmatprep.subr.bf16.mxu0 %v3566_v10 }
 0x623   :  { %2562 = vmatpush1.bf16.msra.mxu1 %v3563_v11  ;;  %3102 = vmatpush3.bf16.msra.mxu0 %v3567_v12 }
 0x624   :  { %2563 = vmatprep.subr.bf16.mxu1 %v3570_v15  ;;  %3103 = vmatprep.subr.bf16.mxu0 %v3571_v17 }
 0x627   :  { %2564 = vmatpush1.bf16.msra.mxu1 %v3568_v18  ;;  %3104 = vmatpush3.bf16.msra.mxu0 %v3572_v19 }
 0x628   :  { %2565 = vmatprep.subr.bf16.mxu1 %v3575_v20  ;;  %3105 = vmatprep.subr.bf16.mxu0 %v3576_v21 }
 0x62b   :  { %2566 = vmatpush1.bf16.msra.mxu1 %v3573_v22  ;;  %3106 = vmatpush3.bf16.msra.mxu0 %v3577_v23 }
 0x62c   :  { %2567 = vmatprep.subr.bf16.mxu1 %v3580_v24  ;;  %3107 = vmatprep.subr.bf16.mxu0 %v3581_v25 }
 0x62f   :  { %2568 = vmatpush1.bf16.msra.mxu1 %v3578_v26  ;;  %3108 = vmatpush3.bf16.msra.mxu0 %v3582_v27 }
 0x630   :  { %2569 = vmatprep.subr.bf16.mxu1 %v3585_v28  ;;  %3109 = vmatprep.subr.bf16.mxu0 %v3586_v29 }
 0x633   :  { %2570 = vmatpush1.bf16.msra.mxu1 %v3583_v30  ;;  %3110 = vmatpush3.bf16.msra.mxu0 %v3587_v31 }
 0x634   :  { %2571 = vmatprep.subr.bf16.mxu1 %v3590_v32 }
 0x636   :  { %2629 = vmatmul.mubr.bf16.vlgmr.msra.gmra.mrb[8].mxu0 %v4273_v0 }
 0x637   :  { %2572 = vmatpush1.bf16.msra.mxu1 %v3588_v33 }
 0x638   :  { %2573 = vmatprep.subr.bf16.mxu1 %v3593_v57 }
 0x63b   :  { %2574 = vmatpush1.bf16.msra.mxu1 %v3591_v34 }
 0x63c   :  { %2575 = vmatprep.subr.bf16.mxu1 %v3596_v35 }
 0x63f   :  { %2576 = vmatpush1.bf16.msra.mxu1 %v3594_v36 }
 0x640   :  { %2577 = vmatprep.subr.bf16.mxu1 %v3599_v37 }
 0x643   :  { %2578 = vmatpush1.bf16.msra.mxu1 %v3597_v38 }
 0x644   :  { %2579 = vmatprep.subr.bf16.mxu1 %v3602_v39 }
 0x647   :  { %2580 = vmatpush1.bf16.msra.mxu1 %v3600_v40 }
 0x648   :  { %2581 = vmatprep.subr.bf16.mxu1 %v3605_v41 }
 0x64b   :  { %2582 = vmatpush1.bf16.msra.mxu1 %v3603_v42 }
 0x64c   :  { %2583 = vmatprep.subr.bf16.mxu1 %v3608_v43 }
 0x64f   :  { %2584 = vmatpush1.bf16.msra.mxu1 %v3606_v44 }
 0x650   :  { %2585 = vmatprep.subr.bf16.mxu1 %v3611_v45 }
 0x653   :  { %2586 = vmatpush1.bf16.msra.mxu1 %v3609_v46 }
 0x656   :  { %2588 = vmatmul.mubr.bf16.vlgmr.msra.gmra.mrb[24].mxu1 %v4273_v0 }
 0x657   :  { %3851 = shalt.err (!%p3848_p6)
}
 0x658   :  { %s3852_s0 = scalar_lea.hbm %s4354_s17, 128 }
 0x659   :  { %p3853_p7 = scmp.ne.s32.totalorder %s4354_s17, %s3852_s0  ;;  %p3856_p8 = scmp.lt.u32.totalorder %s3852_s0, %s4354_s17 }
 0x65b   :  { %p3858_p9 = pnand %p3856_p8, %p3853_p7 }
 0x65d   :  { %3861 = shalt.err (!%p3858_p9)
}
 0x65e   :  { %2707 = dma.vmem_to_hbm [thread:$0]  %s2705_s25, 128, %s4354_s17, [#allocation19]  }
 0x65f   :  { %s3963_s8 = smov [#allocation20]   ;;  %s3964_s1 = smov [#allocation21]  }
 0x660   :  { %s2714_s14 = sshll.u32 %s3963_s8, 4  ;;  %s2724_s27 = sshll.u32 %s3964_s1, 4  ;;  %s2715_s14 = int_to_ptr.vmem [resolvable:$true] %s2714_s14  ;;  %s2725_s27 = int_to_ptr.vmem [resolvable:$true] %s2724_s27 }
 0x661   :  { %s3862_s21 = scalar_lea.vmem %s2715_s14, 128  ;;  %p3867_p11 = scmp.lt.s32.totalorder %s2715_s14, %s2715_s14 }
 0x662   :  { %p3863_p10 = scmp.ne.s32.totalorder %s2715_s14, %s3862_s21  ;;  %p3868_p12 = scmp.lt.s32.totalorder %s3862_s21, %s3862_s21 }
 0x664   :  { %p3869_p13 = por %p3868_p12, %p3867_p11 }
 0x666   :  { %p3870_p0 = pnand %p3869_p13, %p3863_p10 }
 0x668   :  { %3873 = shalt.err (!%p3870_p0)
}
 0x669   :  { %s3874_s24 = scalar_lea.hbm %s4355_s18, 128 }
 0x66a   :  { %p3875_p1 = scmp.ne.s32.totalorder %s4355_s18, %s3874_s24  ;;  %p3878_p2 = scmp.lt.u32.totalorder %s3874_s24, %s4355_s18 }
 0x66c   :  { %p3880_p3 = pnand %p3878_p2, %p3875_p1 }
 0x66e   :  { %3883 = shalt.err (!%p3880_p3)
}
 0x66f   :  { %2717 = dma.vmem_to_hbm [thread:$0]  %s2715_s14, 128, %s4355_s18, [#allocation19]  }
 0x670   :  { %s3884_s22 = scalar_lea.vmem %s2725_s27, 128  ;;  %p3889_p5 = scmp.lt.s32.totalorder %s2725_s27, %s2725_s27 }
 0x671   :  { %p3885_p4 = scmp.ne.s32.totalorder %s2725_s27, %s3884_s22  ;;  %p3890_p6 = scmp.lt.s32.totalorder %s3884_s22, %s3884_s22 }
 0x673   :  { %p3891_p7 = por %p3890_p6, %p3889_p5 }
 0x675   :  { %p3892_p8 = pnand %p3891_p7, %p3885_p4 }
 0x677   :  { %3895 = shalt.err (!%p3892_p8)
}
 0x678   :  { %s3896_s26 = scalar_lea.hbm %s4356_s19, 128 }
 0x679   :  { %p3897_p9 = scmp.ne.s32.totalorder %s4356_s19, %s3896_s26  ;;  %p3900_p10 = scmp.lt.u32.totalorder %s3896_s26, %s4356_s19 }
 0x67b   :  { %p3902_p11 = pnand %p3900_p10, %p3897_p9 }
 0x67d   :  { %3905 = shalt.err (!%p3902_p11)
}
 0x67e   :  { %2727 = dma.vmem_to_hbm [thread:$0]  %s2725_s27, 128, %s4356_s19, [#allocation22]   ;;  %v1872_v47 = vsub.s32 2, %v4213_v13  ;;  %v1860_v48 = vld [vmem:[%s4352_s15] sm:$0xff]  ;;  %v1876_v49 = vsub.s32 3, %v4213_v13  ;;  %v1888_v17 = vsub.s32 6, %v4213_v13 }
 0x67f   :  { %v1865_v50 = vrot.slane %v1860_v48, %v4216_v14  ;;  %v1869_v52 = vrot.slane %v1860_v48, %v4222_v16  ;;  %v1880_v31 = vsub.s32 4, %v4213_v13  ;;  %v1884_v32 = vsub.s32 5, %v4213_v13  ;;  %s3965_s15 = smov [#allocation17]  }
 0x680   :  { %v1873_v51 = vrot.slane %v1860_v48, %v1872_v47  ;;  %v1877_v53 = vrot.slane %v1860_v48, %v1876_v49  ;;  %v1889_v22 = vrot.slane %v1860_v48, %v1888_v17  ;;  %s2694_s19 = sshll.u32 %s3965_s15, 4  ;;  %s2695_s19 = int_to_ptr.vmem [resolvable:$true] %s2694_s19 }
 0x681   :  { %v1881_v33 = vrot.slane %v1860_v48, %v1880_v31  ;;  %v1885_v57 = vrot.slane %v1860_v48, %v1884_v32  ;;  %s3906_s29 = scalar_lea.vmem %s2695_s19, 896  ;;  %p3911_p13 = scmp.lt.s32.totalorder %s2695_s19, %s2695_s19 }
 0x682   :  { %p3907_p12 = scmp.ne.s32.totalorder %s2695_s19, %s3906_s29  ;;  %p3912_p0 = scmp.lt.s32.totalorder %s3906_s29, %s3906_s29 }
 0x684   :  { %p3913_p1 = por %p3912_p0, %p3911_p13 }
 0x686   :  { %p3914_p2 = pnand %p3913_p1, %p3907_p12 }
 0x6e9   :  { %v2507_v54 = vpop.f32.mrb[20].mxu1  ;;  %v2548_v55 = vpop.f32.mrb[4].mxu0 }
 0x6ea   :  { %v2508_v56 = vadd.f32 %v2507_v54, %v1865_v50  ;;  %v2549_v58 = vadd.f32 %v2548_v55, %v1873_v51  ;;  %v2509_v59 = vpop.f32.mrb[21].mxu1  ;;  %v2550_v60 = vpop.f32.mrb[5].mxu0 }
 0x6eb   :  { %v2510_v61 = vadd.f32 %v2509_v59, %v1869_v52  ;;  %v2551_v62 = vadd.f32 %v2550_v60, %v1877_v53  ;;  %v2511_v63 = vpop.f32.mrb[22].mxu1  ;;  %v2552_v0 = vpop.f32.mrb[6].mxu0 }
 0x6ec   :  { %v3039_v1 = vmul.f32 -1.442695, %v2508_v56  ;;  %v3041_v2 = vmul.f32 -1.442695, %v2549_v58  ;;  %v2512_v3 = vpop.f32.mrb[23].mxu1  ;;  %v2553_v4 = vpop.f32.mrb[7].mxu0 }
 0x6ed   :  { %v3040_v5 = vmul.f32 -1.442695, %v2510_v61  ;;  %v3042_v14 = vmul.f32 -1.442695, %v2551_v62 }
 0x6ee   :  { %3614 = vpow2.f32 %v3039_v1 }
 0x6ef   :  { %3616 = vpow2.f32 %v3041_v2 }
 0x6f0   :  { %3618 = vpow2.f32 %v3040_v5 }
 0x6f1   :  { %3620 = vpow2.f32 %v3042_v14 }
 0x6f8   :  { %v3615_v16 = vpop.eup %3614 }
 0x6f9   :  { %v3617_v6 = vpop.eup %3616  ;;  %v2657_v7 = vadd.f32 1.0, %v3615_v16 }
 0x6fa   :  { %v3619_v8 = vpop.eup %3618  ;;  %v2659_v9 = vadd.f32 1.0, %v3617_v6 }
 0x6fb   :  { %v3621_v10 = vpop.eup %3620  ;;  %3622 = vrcp.f32 %v2657_v7  ;;  %v2658_v11 = vadd.f32 1.0, %v3619_v8 }
 0x6fc   :  { %3624 = vrcp.f32 %v2659_v9  ;;  %v2660_v12 = vadd.f32 1.0, %v3621_v10 }
 0x6fd   :  { %3626 = vrcp.f32 %v2658_v11 }
 0x6fe   :  { %3628 = vrcp.f32 %v2660_v12 }
 0x705   :  { %v3623_v15 = vpop.eup %3622 }
 0x706   :  { %v3625_v18 = vpop.eup %3624  ;;  %2678 = vst [vmem:[#allocation17] sm:$0xff] %v3623_v15 }
 0x707   :  { %v3627_v19 = vpop.eup %3626  ;;  %2680 = vst [vmem:[#allocation17 + $0x10] sm:$0xff] %v3625_v18 }
 0x708   :  { %v3629_v20 = vpop.eup %3628  ;;  %2679 = vst [vmem:[#allocation17 + $0x8] sm:$0xff] %v3627_v19 }
 0x709   :  { %2681 = vst [vmem:[#allocation17 + $0x18] sm:$0xff] %v3629_v20  ;;  %v3111_v21 = vpop.f32.mrb[8].mxu0 }
 0x70a   :  { %v3112_v23 = vpop.f32.mrb[9].mxu0 }
 0x70b   :  { %v3113_v24 = vadd.f32 %v3112_v23, %v3111_v21  ;;  %v3114_v25 = vpop.f32.mrb[10].mxu0 }
 0x70c   :  { %v3115_v26 = vpop.f32.mrb[11].mxu0 }
 0x70d   :  { %v2631_v27 = vadd.f32 %v3113_v24, %v1889_v22 }
 0x70f   :  { %v3045_v28 = vmul.f32 -1.442695, %v2631_v27 }
 0x711   :  { %3630 = vpow2.f32 %v3045_v28 }
 0x71b   :  { %v3631_v29 = vpop.eup %3630 }
 0x71c   :  { %v2663_v30 = vadd.f32 1.0, %v3631_v29 }
 0x71e   :  { %3632 = vrcp.f32 %v2663_v30 }
 0x728   :  { %v3633_v34 = vpop.eup %3632 }
 0x729   :  { %2684 = vst [vmem:[#allocation17 + $0x30] sm:$0xff] %v3633_v34  ;;  %v2589_v35 = vpop.f32.mrb[24].mxu1 }
 0x72a   :  { %v2590_v36 = vadd.f32 %v2589_v35, %v1881_v33  ;;  %v2591_v37 = vpop.f32.mrb[25].mxu1 }
 0x72b   :  { %v2592_v38 = vadd.f32 %v2591_v37, %v1885_v57  ;;  %v2593_v39 = vpop.f32.mrb[26].mxu1 }
 0x72c   :  { %v3043_v40 = vmul.f32 -1.442695, %v2590_v36  ;;  %v2594_v41 = vpop.f32.mrb[27].mxu1 }
 0x72d   :  { %v3044_v42 = vmul.f32 -1.442695, %v2592_v38 }
 0x72e   :  { %3634 = vpow2.f32 %v3043_v40 }
 0x72f   :  { %3636 = vpow2.f32 %v3044_v42 }
 0x738   :  { %v3635_v43 = vpop.eup %3634 }
 0x739   :  { %v3637_v44 = vpop.eup %3636  ;;  %v2661_v45 = vadd.f32 1.0, %v3635_v43 }
 0x73a   :  { %v2662_v46 = vadd.f32 1.0, %v3637_v44 }
 0x73b   :  { %3638 = vrcp.f32 %v2661_v45 }
 0x73c   :  { %3640 = vrcp.f32 %v2662_v46 }
 0x745   :  { %v3639_v13 = vpop.eup %3638 }
 0x746   :  { %v3641_v47 = vpop.eup %3640  ;;  %2682 = vst [vmem:[#allocation17 + $0x20] sm:$0xff] %v3639_v13 }
 0x747   :  { %2683 = vst [vmem:[#allocation17 + $0x28] sm:$0xff] %v3641_v47 }
 0x748   :  { %3917 = shalt.err (!%p3914_p2)
}
 0x749   :  { %s3918_s14 = scalar_lea.hbm %s4353_s16, 896 }
 0x74a   :  { %p3919_p3 = scmp.ne.s32.totalorder %s4353_s16, %s3918_s14  ;;  %p3922_p4 = scmp.lt.u32.totalorder %s3918_s14, %s4353_s16 }
 0x74c   :  { %p3924_p5 = pnand %p3922_p4, %p3919_p3 }
 0x74e   :  { %3927 = shalt.err (!%p3924_p5)
}
 0x74f   :  { %2697 = dma.vmem_to_hbm [thread:$0]  %s2695_s19, 896, %s4353_s16, [#allocation4]  }
 0x750   :  { %3938 = dma.done.wait [#allocation4], 896  }
 0x751   :  { %3939 = vsyncadd [#allocation4], 4294966400 }
 0x752   :  { %3940 = dma.done.wait [#allocation19], 256  }
 0x753   :  { %3941 = vsyncadd [#allocation19], 4294967040 }
 0x754   :  { %3942 = dma.done.wait [#allocation22], 128  }
 0x755   :  { %3943 = vsyncadd [#allocation22], 4294967168 }
 0x756   :  { %2740 = vsyncpa [#allocation3], 1 }
 0x757   :  { %2741 = vsyncpa [#allocation6], 1 }
 0x758   :  { %2742 = vsyncpa [#allocation9], 1 }
 0x759   :  { %2743 = vsyncpa [#allocation12], 1 }
 0x75a   :  { %2744 = vsyncpa [#allocation15], 1 }
 0x75b   :  { %2745 = vsyncpa [#allocation4], 1 }
 0x75c   :  { %2746 = vsyncpa [#allocation19], 1 }
 0x75d   :  { %2747 = vsyncpa [#allocation22], 1 }

</bundles_post_ra>
